<compile_context>
chip_gen: v7x
topology: tpu7x:2x2x1
jax: 0.10.0
libtpu: 0.0.40
codegen_flags: <defaults>
</compile_context>

<pallas_src>
import jax
import jax.numpy as jnp
from jax.experimental import pallas as pl
from jax.experimental.pallas import tpu as pltpu


def gru_chunk_kernel(gx_ref, whh_ref, bhn_ref, lens_ref, out_ref):
    """Tc GRU timesteps for one batch tile, hidden state carried in vregs.

    gx_ref:   (Tc, bt, 3H) bf16 pre-computed x-side gates x_t @ W_ih^T + folded biases (r|z|n)
    whh_ref:  (H, 3H)      bf16 hidden->hidden weights, transposed + gate-fused (r|z|n)
    bhn_ref:  (1, H)       f32  hidden bias of n gate (kept separate: n uses r*(Wh h + b_hn))
    lens_ref: (bt, 1)      i32  per-row valid lengths (prefix attention mask)
    out_ref:  (bt, H)      f32  carried hidden state (VMEM-resident across the chunk axis;
                                written back to HBM only when the batch tile changes)
    """
    c = pl.program_id(1)
    Tc = gx_ref.shape[0]
    bt, H = out_ref.shape

    @pl.when(c == 0)
    def _init():
        out_ref[...] = jnp.zeros_like(out_ref)

    # Hoisted loads / broadcasts (paid once per chunk, not once per timestep).
    h = out_ref[...]                                            # (bt, H) f32
    whh = whh_ref[...]                                          # (H, 3H) bf16, resident
    lens = lens_ref[...]                                        # (bt, 1) i32
    bhn = jnp.broadcast_to(bhn_ref[...], (bt, H))               # (bt, H) f32

    t0 = c * Tc
    for i in range(Tc):                                         # static, fully unrolled
        gx = gx_ref[i].astype(jnp.float32)                      # (bt, 3H)
        # Single fused MXU matmul for all three gates; bf16 operands, f32 acc.
        gh = jnp.dot(h.astype(jnp.bfloat16), whh,
                     preferred_element_type=jnp.float32)        # (bt, 3H)
        r = jax.nn.sigmoid(gx[:, :H] + gh[:, :H])
        z = jax.nn.sigmoid(gx[:, H:2 * H] + gh[:, H:2 * H])
        n = jnp.tanh(gx[:, 2 * H:] + r * (gh[:, 2 * H:] + bhn))
        h_new = (1.0 - z) * n + z * h
        # Freeze rows whose prefix length is exhausted -> after all steps the
        # carried state equals output[b, lengths[b]-1, :] of the packed reference.
        h = jnp.where(lens > (t0 + i), h_new, h)

    out_ref[...] = h


def _tpu_tensorcore_info():
    """(tensorcores_per_chip, vmem_limit_cap_bytes).

    v7x: 2 TCs but only 64 MiB VMEM/TC -> cap ~56 MiB (headroom for the compiler).
    v5e/v6e: 1 TC, 128 MiB physical -> allow up to ~100 MiB.
    """
    kind = ""
    try:
        kind = jax.devices()[0].device_kind.lower()
    except Exception:
        pass
    is_v7 = ("v7" in kind) or ("tpu7" in kind)
    if is_v7:
        return 2, 56 * 1024 * 1024
    return 1, 100 * 1024 * 1024


def init_params(key, hidden_size):
    """Deterministic GRU + classifier params (torch.nn.GRU / Linear init ranges),
    pre-transposed and gate-fused for the kernel."""
    H = hidden_size
    k = 1.0 / jnp.sqrt(jnp.float32(H))
    keys = jax.random.split(key, 6)
    # torch weight_ih_l0 / weight_hh_l0: (3H, H), gate order (r, z, n)
    w_ih = jax.random.uniform(keys[0], (3, H, H), jnp.float32, -k, k)
    w_hh = jax.random.uniform(keys[1], (3, H, H), jnp.float32, -k, k)
    b_ih = jax.random.uniform(keys[2], (3, H), jnp.float32, -k, k)
    b_hh = jax.random.uniform(keys[3], (3, H), jnp.float32, -k, k)
    # classifier: torch Linear(H, 1) -> weight (1, H), bias (1,); stored transposed
    w_c = jax.random.uniform(keys[4], (H, 1), jnp.float32, -k, k)
    b_c = jax.random.uniform(keys[5], (1,), jnp.float32, -k, k)

    # Pre-transpose and fuse gates along the lane dim: columns = [r | z | n].
    w_ih_cat = jnp.concatenate([w_ih[0].T, w_ih[1].T, w_ih[2].T], axis=1)   # (H, 3H)
    w_hh_cat = jnp.concatenate([w_hh[0].T, w_hh[1].T, w_hh[2].T], axis=1)   # (H, 3H)
    # Fold b_ih (all gates) + b_hh (r, z only) into the x-side gates; b_hn stays
    # separate because n = tanh(Wx + b_in + r*(Wh h + b_hn)).
    b_x_cat = jnp.concatenate([b_ih[0] + b_hh[0], b_ih[1] + b_hh[1], b_ih[2]])  # (3H,)
    b_hn = b_hh[2]                                                              # (H,)
    return dict(w_ih_cat=w_ih_cat, w_hh_cat=w_hh_cat, b_x_cat=b_x_cat,
                b_hn=b_hn, w_c=w_c, b_c=b_c)


def base_rnn_forward(hidden_states, attention_mask, params):
    """hidden_states: (B, T, H); attention_mask: (B, T) {0,1} prefix mask.
    Returns logits of shape (B, 1), as in BaseRNN.forward (unidirectional GRU)."""
    B, T, H = hidden_states.shape
    G = 3 * H
    x = hidden_states.astype(jnp.float32)
    lengths = jnp.sum(attention_mask.astype(jnp.int32), axis=1)          # (B,)
    # NOTE: rows with length 0 keep h == 0 (torch's pack_padded_sequence would raise).

    num_tc, vmem_cap = _tpu_tensorcore_info()

    # ---- batch padding & TensorCore-aware batch split -----------------------
    B_pad = ((B + 7) // 8) * 8
    if B_pad != B:
        x = jnp.pad(x, ((0, B_pad - B), (0, 0), (0, 0)))
        lengths = jnp.pad(lengths, (0, B_pad - B))
    # Split the batch only on 2-TC chips (v7x) and only when each half keeps
    # >= 16 rows (clean bf16 sublane tiles, still MXU-meaningful).  On v5e/v6e a
    # split just doubles grid steps and halves MXU row occupancy.
    nb = 2 if (num_tc >= 2 and B_pad % 32 == 0) else 1
    bt = B_pad // nb

    # ---- time chunking (collapse T into an in-kernel unrolled loop) ---------
    TC_UNROLL_CAP = 16                                   # code-size bound for the unrolled loop
    # Keep the double-buffered bf16 gates chunk under ~8 MiB of VMEM.
    tc_vmem = max(1, (8 * 1024 * 1024) // max(1, 2 * bt * G * 2))
    tc_max = max(1, min(T, TC_UNROLL_CAP, tc_vmem))
    num_chunks = -(-T // tc_max)
    Tc = -(-T // num_chunks)                             # balanced chunk size
    T_pad = num_chunks * Tc
    if T_pad != T:
        x = jnp.pad(x, ((0, 0), (0, T_pad - T), (0, 0))) # padded steps are masked by lengths

    # ---- hoisted x-side GEMM, time-major, streamed as bf16 ------------------
    # Transpose the H-wide input (NOT the 3H-wide gates result) to time-major so
    # any materialized transpose costs <= 1/3 of transposing the gates tensor.
    x_tm = jnp.transpose(x, (1, 0, 2))                                      # (T_pad, B_pad, H)
    gates_x = (jnp.einsum("tbh,hg->tbg", x_tm, params["w_ih_cat"],
                          preferred_element_type=jnp.float32)
               + params["b_x_cat"][None, None, :]).astype(jnp.bfloat16)     # (T_pad, B_pad, 3H)

    whh = params["w_hh_cat"].astype(jnp.bfloat16)                           # (H, 3H)
    bhn = params["b_hn"].reshape(1, H).astype(jnp.float32)                  # (1, H)
    lens2d = lengths.reshape(B_pad, 1).astype(jnp.int32)                    # (B_pad, 1)

    # ---- generation-aware VMEM budget ---------------------------------------
    need = (2 * Tc * bt * G * 2          # gates_x chunk, double-buffered, bf16
            + 2 * H * G * 2              # W_hh (resident, default double-buffered), bf16
            + 2 * bt * H * 4             # output accumulator buffers, f32
            + 2 * (bt + 8) * 128 * 4)    # lane-padded lengths + b_hn
    vmem_limit = int(min(max(2 * need, 32 * 1024 * 1024), vmem_cap))

    grid_spec = pltpu.PrefetchScalarGridSpec(
        num_scalar_prefetch=0,
        grid=(nb, num_chunks),
        in_specs=[
            pl.BlockSpec((Tc, bt, G), lambda b, c: (c, b, 0)),   # gates_x chunk (bf16 stream)
            pl.BlockSpec((H, G), lambda b, c: (0, 0)),           # W_hh (resident)
            pl.BlockSpec((1, H), lambda b, c: (0, 0)),           # b_hn (resident)
            pl.BlockSpec((bt, 1), lambda b, c: (b, 0)),          # lengths
        ],
        out_specs=pl.BlockSpec((bt, H), lambda b, c: (b, 0)),    # carried hidden state
    )

    h_last = pl.pallas_call(
        gru_chunk_kernel,
        out_shape=jax.ShapeDtypeStruct((B_pad, H), jnp.float32),
        grid_spec=grid_spec,
        compiler_params=pltpu.CompilerParams(
            dimension_semantics=("parallel", "arbitrary"),
            vmem_limit_bytes=vmem_limit),
    )(gates_x, whh, bhn, lens2d)

    h_last = h_last[:B]
    # Classifier Linear(H, 1) stays in XLA: a (B, 1) kernel output would lower to
    # masked lane-1 partial stores (measured ~4.5x store-path penalty).
    return h_last @ params["w_c"] + params["b_c"]


def base_rnn_reference(hidden_states, attention_mask, params):
    """Pure-JAX f32 reference of the same forward pass (for correctness check)."""
    B, T, H = hidden_states.shape
    x = hidden_states.astype(jnp.float32)
    lengths = jnp.sum(attention_mask.astype(jnp.int32), axis=1)
    w_ih, w_hh = params["w_ih_cat"], params["w_hh_cat"]
    b_x, b_hn = params["b_x_cat"], params["b_hn"]

    def step(h, inp):
        x_t, t = inp
        gx = x_t @ w_ih + b_x
        gh = h @ w_hh
        r = jax.nn.sigmoid(gx[:, :H] + gh[:, :H])
        z = jax.nn.sigmoid(gx[:, H:2 * H] + gh[:, H:2 * H])
        n = jnp.tanh(gx[:, 2 * H:] + r * (gh[:, 2 * H:] + b_hn))
        h_new = (1.0 - z) * n + z * h
        keep = (t < lengths)[:, None]
        return jnp.where(keep, h_new, h), None

    h0 = jnp.zeros((B, H), jnp.float32)
    h_last, _ = jax.lax.scan(step, h0, (jnp.swapaxes(x, 0, 1), jnp.arange(T)))
    return h_last @ params["w_c"] + params["b_c"]


if __name__ == "__main__":
    # Small but TPU-friendly shapes: H multiple of 128 (lane-aligned gate slices),
    # B=14 exercises the pad-to-8 path; T=24 exercises the multi-chunk time loop
    # (two unrolled chunks with the hidden state carried across the chunk boundary).
    B, T, H = 14, 24, 128

    key = jax.random.PRNGKey(0)
    k_x, k_len, k_p = jax.random.split(key, 3)

    hidden_states = jax.random.normal(k_x, (B, T, H), dtype=jnp.float32)
    lengths = jax.random.randint(k_len, (B,), 1, T + 1)
    attention_mask = (jnp.arange(T)[None, :] < lengths[:, None]).astype(jnp.int32)

    params = init_params(k_p, H)

    logits = jax.jit(base_rnn_forward)(hidden_states, attention_mask, params)
    logits = jax.block_until_ready(logits)
    assert logits.shape == (B, 1) and logits.dtype == jnp.float32

    ref = jax.jit(base_rnn_reference)(hidden_states, attention_mask, params)
    err = float(jnp.max(jnp.abs(logits - ref)))
    assert err < 5e-2, f"kernel vs reference max abs err = {err}"

    print("KERNEL_OK")
</pallas_src>

<mosaic_0001>
module attributes {stable_mosaic.version = 11 : i64} {
  func.func @gru_chunk_kernel(%arg0: i32, %arg1: i32, %arg2: memref<12x16x384xbf16, #tpu.memory_space<vmem>>, %arg3: memref<128x384xbf16, #tpu.memory_space<vmem>>, %arg4: memref<1x128xf32, #tpu.memory_space<vmem>>, %arg5: memref<16x1xi32, #tpu.memory_space<vmem>>, %arg6: memref<16x128xf32, #tpu.memory_space<vmem>>) attributes {dimension_semantics = [#tpu.dimension_semantics<parallel>, #tpu.dimension_semantics<arbitrary>], iteration_bounds = array<i64: 1, 2>, scalar_prefetch = 0 : i64, scratch_operands = 0 : i64, tpu.core_type = #tpu.core_type<tc>, window_params = [{transform_indices = @transform_0, window_bounds = array<i64: 12, 16, 384>}, {pipeline_mode = #tpu.pipeline_mode<synchronous>, transform_indices = @transform_1, window_bounds = array<i64: 128, 384>}, {pipeline_mode = #tpu.pipeline_mode<synchronous>, transform_indices = @transform_2, window_bounds = array<i64: 1, 128>}, {transform_indices = @transform_3, window_bounds = array<i64: 16, 1>}, {transform_indices = @transform_4, window_bounds = array<i64: 16, 128>}]} {
    %c0_i32 = arith.constant 0 : i32
    %0 = arith.cmpi eq, %arg1, %c0_i32 : i32
    %1 = arith.extui %0 : i1 to i32
    %c0_i32_0 = arith.constant 0 : i32
    %2 = arith.cmpi ne, %1, %c0_i32_0 : i32
    scf.if %2 {
      %cst_83 = arith.constant 0.000000e+00 : f32
      %467 = vector.broadcast %cst_83 : f32 to vector<16x128xf32>
      %c0_84 = arith.constant 0 : index
      %c0_85 = arith.constant 0 : index
      %468 = vector.load %arg6[%c0_84, %c0_85] : memref<16x128xf32, #tpu.memory_space<vmem>>, vector<16x128xf32>
      tpu.vector_store %arg6[%c0_84, %c0_85], %467 {strides = array<i32>} : memref<16x128xf32, #tpu.memory_space<vmem>>, vector<16x128xf32>,
    } else {
    }
    %c0 = arith.constant 0 : index
    %c0_1 = arith.constant 0 : index
    %3 = vector.load %arg6[%c0, %c0_1] : memref<16x128xf32, #tpu.memory_space<vmem>>, vector<16x128xf32>
    %c0_2 = arith.constant 0 : index
    %c0_3 = arith.constant 0 : index
    %4 = vector.load %arg3[%c0_2, %c0_3] : memref<128x384xbf16, #tpu.memory_space<vmem>>, vector<128x384xbf16>
    %c0_4 = arith.constant 0 : index
    %c0_5 = arith.constant 0 : index
    %5 = vector.load %arg5[%c0_4, %c0_5] : memref<16x1xi32, #tpu.memory_space<vmem>>, vector<16x1xi32>
    %c0_6 = arith.constant 0 : index
    %c0_7 = arith.constant 0 : index
    %6 = vector.load %arg4[%c0_6, %c0_7] : memref<1x128xf32, #tpu.memory_space<vmem>>, vector<1x128xf32>
    %7 = vector.shape_cast %6 : vector<1x128xf32> to vector<1x128xf32>
    %8 = vector.broadcast %7 : vector<1x128xf32> to vector<16x128xf32>
    %c12_i32 = arith.constant 12 : i32
    %9 = arith.muli %arg1, %c12_i32 : i32
    %c0_8 = arith.constant 0 : index
    %c0_9 = arith.constant 0 : index
    %c0_10 = arith.constant 0 : index
    %10 = vector.load %arg2[%c0_8, %c0_9, %c0_10] : memref<12x16x384xbf16, #tpu.memory_space<vmem>>, vector<1x16x384xbf16>
    %11 = vector.shape_cast %10 : vector<1x16x384xbf16> to vector<16x384xbf16>
    %12 = arith.extf %11 : vector<16x384xbf16> to vector<16x384xf32>
    %13 = arith.truncf %3 : vector<16x128xf32> to vector<16x128xbf16>
    %cst = arith.constant dense<0.000000e+00> : vector<16x384xf32>
    %14 = tpu.matmul %13, %4, %cst {dimension_numbers = #tpu.dot_dimension_numbers<[1], [0], [0], [1], [0, 0, 1, 1], [], []>} : vector<16x128xbf16>, vector<128x384xbf16>, vector<16x384xf32> -> vector<16x384xf32>
    %15 = vector.extract_strided_slice %12 {offsets = [0, 0], sizes = [16, 128], strides = [1, 1]} : vector<16x384xf32> to vector<16x128xf32>
    %16 = vector.extract_strided_slice %14 {offsets = [0, 0], sizes = [16, 128], strides = [1, 1]} : vector<16x384xf32> to vector<16x128xf32>
    %17 = arith.addf %15, %16 : vector<16x128xf32>
    %18 = arith.negf %17 : vector<16x128xf32>
    %19 = math.exp %18 : vector<16x128xf32>
    %cst_11 = arith.constant 1.000000e+00 : f32
    %20 = vector.broadcast %cst_11 : f32 to vector<16x128xf32>
    %21 = arith.addf %20, %19 : vector<16x128xf32>
    %22 = arith.divf %20, %21 : vector<16x128xf32>
    %23 = vector.extract_strided_slice %12 {offsets = [0, 128], sizes = [16, 128], strides = [1, 1]} : vector<16x384xf32> to vector<16x128xf32>
    %24 = vector.extract_strided_slice %14 {offsets = [0, 128], sizes = [16, 128], strides = [1, 1]} : vector<16x384xf32> to vector<16x128xf32>
    %25 = arith.addf %23, %24 : vector<16x128xf32>
    %26 = arith.negf %25 : vector<16x128xf32>
    %27 = math.exp %26 : vector<16x128xf32>
    %cst_12 = arith.constant 1.000000e+00 : f32
    %28 = vector.broadcast %cst_12 : f32 to vector<16x128xf32>
    %29 = arith.addf %28, %27 : vector<16x128xf32>
    %30 = arith.divf %28, %29 : vector<16x128xf32>
    %31 = vector.extract_strided_slice %12 {offsets = [0, 256], sizes = [16, 128], strides = [1, 1]} : vector<16x384xf32> to vector<16x128xf32>
    %32 = vector.extract_strided_slice %14 {offsets = [0, 256], sizes = [16, 128], strides = [1, 1]} : vector<16x384xf32> to vector<16x128xf32>
    %33 = arith.addf %32, %8 : vector<16x128xf32>
    %34 = arith.mulf %22, %33 : vector<16x128xf32>
    %35 = arith.addf %31, %34 : vector<16x128xf32>
    %36 = math.tanh %35 : vector<16x128xf32>
    %cst_13 = arith.constant 1.000000e+00 : f32
    %37 = vector.broadcast %cst_13 : f32 to vector<16x128xf32>
    %38 = arith.subf %37, %30 : vector<16x128xf32>
    %39 = arith.mulf %38, %36 : vector<16x128xf32>
    %40 = arith.mulf %30, %3 : vector<16x128xf32>
    %41 = arith.addf %39, %40 : vector<16x128xf32>
    %c0_i32_14 = arith.constant 0 : i32
    %42 = arith.addi %9, %c0_i32_14 : i32
    %43 = vector.broadcast %42 : i32 to vector<16x1xi32>
    %44 = arith.cmpi sgt, %5, %43 : vector<16x1xi32>
    %45 = vector.shape_cast %44 : vector<16x1xi1> to vector<16x1xi1>
    %46 = vector.broadcast %45 : vector<16x1xi1> to vector<16x128xi1>
    %47 = arith.select %46, %41, %3 : vector<16x128xi1>, vector<16x128xf32>
    %c1 = arith.constant 1 : index
    %c0_15 = arith.constant 0 : index
    %c0_16 = arith.constant 0 : index
    %48 = vector.load %arg2[%c1, %c0_15, %c0_16] : memref<12x16x384xbf16, #tpu.memory_space<vmem>>, vector<1x16x384xbf16>
    %49 = vector.shape_cast %48 : vector<1x16x384xbf16> to vector<16x384xbf16>
    %50 = arith.extf %49 : vector<16x384xbf16> to vector<16x384xf32>
    %51 = arith.truncf %47 : vector<16x128xf32> to vector<16x128xbf16>
    %cst_17 = arith.constant dense<0.000000e+00> : vector<16x384xf32>
    %52 = tpu.matmul %51, %4, %cst_17 {dimension_numbers = #tpu.dot_dimension_numbers<[1], [0], [0], [1], [0, 0, 1, 1], [], []>} : vector<16x128xbf16>, vector<128x384xbf16>, vector<16x384xf32> -> vector<16x384xf32>
    %53 = vector.extract_strided_slice %50 {offsets = [0, 0], sizes = [16, 128], strides = [1, 1]} : vector<16x384xf32> to vector<16x128xf32>
    %54 = vector.extract_strided_slice %52 {offsets = [0, 0], sizes = [16, 128], strides = [1, 1]} : vector<16x384xf32> to vector<16x128xf32>
    %55 = arith.addf %53, %54 : vector<16x128xf32>
    %56 = arith.negf %55 : vector<16x128xf32>
    %57 = math.exp %56 : vector<16x128xf32>
    %cst_18 = arith.constant 1.000000e+00 : f32
    %58 = vector.broadcast %cst_18 : f32 to vector<16x128xf32>
    %59 = arith.addf %58, %57 : vector<16x128xf32>
    %60 = arith.divf %58, %59 : vector<16x128xf32>
    %61 = vector.extract_strided_slice %50 {offsets = [0, 128], sizes = [16, 128], strides = [1, 1]} : vector<16x384xf32> to vector<16x128xf32>
    %62 = vector.extract_strided_slice %52 {offsets = [0, 128], sizes = [16, 128], strides = [1, 1]} : vector<16x384xf32> to vector<16x128xf32>
    %63 = arith.addf %61, %62 : vector<16x128xf32>
    %64 = arith.negf %63 : vector<16x128xf32>
    %65 = math.exp %64 : vector<16x128xf32>
    %cst_19 = arith.constant 1.000000e+00 : f32
    %66 = vector.broadcast %cst_19 : f32 to vector<16x128xf32>
    %67 = arith.addf %66, %65 : vector<16x128xf32>
    %68 = arith.divf %66, %67 : vector<16x128xf32>
    %69 = vector.extract_strided_slice %50 {offsets = [0, 256], sizes = [16, 128], strides = [1, 1]} : vector<16x384xf32> to vector<16x128xf32>
    %70 = vector.extract_strided_slice %52 {offsets = [0, 256], sizes = [16, 128], strides = [1, 1]} : vector<16x384xf32> to vector<16x128xf32>
    %71 = arith.addf %70, %8 : vector<16x128xf32>
    %72 = arith.mulf %60, %71 : vector<16x128xf32>
    %73 = arith.addf %69, %72 : vector<16x128xf32>
    %74 = math.tanh %73 : vector<16x128xf32>
    %cst_20 = arith.constant 1.000000e+00 : f32
    %75 = vector.broadcast %cst_20 : f32 to vector<16x128xf32>
    %76 = arith.subf %75, %68 : vector<16x128xf32>
    %77 = arith.mulf %76, %74 : vector<16x128xf32>
    %78 = arith.mulf %68, %47 : vector<16x128xf32>
    %79 = arith.addf %77, %78 : vector<16x128xf32>
    %c1_i32 = arith.constant 1 : i32
    %80 = arith.addi %9, %c1_i32 : i32
    %81 = vector.broadcast %80 : i32 to vector<16x1xi32>
    %82 = arith.cmpi sgt, %5, %81 : vector<16x1xi32>
    %83 = vector.shape_cast %82 : vector<16x1xi1> to vector<16x1xi1>
    %84 = vector.broadcast %83 : vector<16x1xi1> to vector<16x128xi1>
    %85 = arith.select %84, %79, %47 : vector<16x128xi1>, vector<16x128xf32>
    %c2 = arith.constant 2 : index
    %c0_21 = arith.constant 0 : index
    %c0_22 = arith.constant 0 : index
    %86 = vector.load %arg2[%c2, %c0_21, %c0_22] : memref<12x16x384xbf16, #tpu.memory_space<vmem>>, vector<1x16x384xbf16>
    %87 = vector.shape_cast %86 : vector<1x16x384xbf16> to vector<16x384xbf16>
    %88 = arith.extf %87 : vector<16x384xbf16> to vector<16x384xf32>
    %89 = arith.truncf %85 : vector<16x128xf32> to vector<16x128xbf16>
    %cst_23 = arith.constant dense<0.000000e+00> : vector<16x384xf32>
    %90 = tpu.matmul %89, %4, %cst_23 {dimension_numbers = #tpu.dot_dimension_numbers<[1], [0], [0], [1], [0, 0, 1, 1], [], []>} : vector<16x128xbf16>, vector<128x384xbf16>, vector<16x384xf32> -> vector<16x384xf32>
    %91 = vector.extract_strided_slice %88 {offsets = [0, 0], sizes = [16, 128], strides = [1, 1]} : vector<16x384xf32> to vector<16x128xf32>
    %92 = vector.extract_strided_slice %90 {offsets = [0, 0], sizes = [16, 128], strides = [1, 1]} : vector<16x384xf32> to vector<16x128xf32>
    %93 = arith.addf %91, %92 : vector<16x128xf32>
    %94 = arith.negf %93 : vector<16x128xf32>
    %95 = math.exp %94 : vector<16x128xf32>
    %cst_24 = arith.constant 1.000000e+00 : f32
    %96 = vector.broadcast %cst_24 : f32 to vector<16x128xf32>
    %97 = arith.addf %96, %95 : vector<16x128xf32>
    %98 = arith.divf %96, %97 : vector<16x128xf32>
    %99 = vector.extract_strided_slice %88 {offsets = [0, 128], sizes = [16, 128], strides = [1, 1]} : vector<16x384xf32> to vector<16x128xf32>
    %100 = vector.extract_strided_slice %90 {offsets = [0, 128], sizes = [16, 128], strides = [1, 1]} : vector<16x384xf32> to vector<16x128xf32>
    %101 = arith.addf %99, %100 : vector<16x128xf32>
    %102 = arith.negf %101 : vector<16x128xf32>
    %103 = math.exp %102 : vector<16x128xf32>
    %cst_25 = arith.constant 1.000000e+00 : f32
    %104 = vector.broadcast %cst_25 : f32 to vector<16x128xf32>
    %105 = arith.addf %104, %103 : vector<16x128xf32>
    %106 = arith.divf %104, %105 : vector<16x128xf32>
    %107 = vector.extract_strided_slice %88 {offsets = [0, 256], sizes = [16, 128], strides = [1, 1]} : vector<16x384xf32> to vector<16x128xf32>
    %108 = vector.extract_strided_slice %90 {offsets = [0, 256], sizes = [16, 128], strides = [1, 1]} : vector<16x384xf32> to vector<16x128xf32>
    %109 = arith.addf %108, %8 : vector<16x128xf32>
    %110 = arith.mulf %98, %109 : vector<16x128xf32>
    %111 = arith.addf %107, %110 : vector<16x128xf32>
    %112 = math.tanh %111 : vector<16x128xf32>
    %cst_26 = arith.constant 1.000000e+00 : f32
    %113 = vector.broadcast %cst_26 : f32 to vector<16x128xf32>
    %114 = arith.subf %113, %106 : vector<16x128xf32>
    %115 = arith.mulf %114, %112 : vector<16x128xf32>
    %116 = arith.mulf %106, %85 : vector<16x128xf32>
    %117 = arith.addf %115, %116 : vector<16x128xf32>
    %c2_i32 = arith.constant 2 : i32
    %118 = arith.addi %9, %c2_i32 : i32
    %119 = vector.broadcast %118 : i32 to vector<16x1xi32>
    %120 = arith.cmpi sgt, %5, %119 : vector<16x1xi32>
    %121 = vector.shape_cast %120 : vector<16x1xi1> to vector<16x1xi1>
    %122 = vector.broadcast %121 : vector<16x1xi1> to vector<16x128xi1>
    %123 = arith.select %122, %117, %85 : vector<16x128xi1>, vector<16x128xf32>
    %c3 = arith.constant 3 : index
    %c0_27 = arith.constant 0 : index
    %c0_28 = arith.constant 0 : index
    %124 = vector.load %arg2[%c3, %c0_27, %c0_28] : memref<12x16x384xbf16, #tpu.memory_space<vmem>>, vector<1x16x384xbf16>
    %125 = vector.shape_cast %124 : vector<1x16x384xbf16> to vector<16x384xbf16>
    %126 = arith.extf %125 : vector<16x384xbf16> to vector<16x384xf32>
    %127 = arith.truncf %123 : vector<16x128xf32> to vector<16x128xbf16>
    %cst_29 = arith.constant dense<0.000000e+00> : vector<16x384xf32>
    %128 = tpu.matmul %127, %4, %cst_29 {dimension_numbers = #tpu.dot_dimension_numbers<[1], [0], [0], [1], [0, 0, 1, 1], [], []>} : vector<16x128xbf16>, vector<128x384xbf16>, vector<16x384xf32> -> vector<16x384xf32>
    %129 = vector.extract_strided_slice %126 {offsets = [0, 0], sizes = [16, 128], strides = [1, 1]} : vector<16x384xf32> to vector<16x128xf32>
    %130 = vector.extract_strided_slice %128 {offsets = [0, 0], sizes = [16, 128], strides = [1, 1]} : vector<16x384xf32> to vector<16x128xf32>
    %131 = arith.addf %129, %130 : vector<16x128xf32>
    %132 = arith.negf %131 : vector<16x128xf32>
    %133 = math.exp %132 : vector<16x128xf32>
    %cst_30 = arith.constant 1.000000e+00 : f32
    %134 = vector.broadcast %cst_30 : f32 to vector<16x128xf32>
    %135 = arith.addf %134, %133 : vector<16x128xf32>
    %136 = arith.divf %134, %135 : vector<16x128xf32>
    %137 = vector.extract_strided_slice %126 {offsets = [0, 128], sizes = [16, 128], strides = [1, 1]} : vector<16x384xf32> to vector<16x128xf32>
    %138 = vector.extract_strided_slice %128 {offsets = [0, 128], sizes = [16, 128], strides = [1, 1]} : vector<16x384xf32> to vector<16x128xf32>
    %139 = arith.addf %137, %138 : vector<16x128xf32>
    %140 = arith.negf %139 : vector<16x128xf32>
    %141 = math.exp %140 : vector<16x128xf32>
    %cst_31 = arith.constant 1.000000e+00 : f32
    %142 = vector.broadcast %cst_31 : f32 to vector<16x128xf32>
    %143 = arith.addf %142, %141 : vector<16x128xf32>
    %144 = arith.divf %142, %143 : vector<16x128xf32>
    %145 = vector.extract_strided_slice %126 {offsets = [0, 256], sizes = [16, 128], strides = [1, 1]} : vector<16x384xf32> to vector<16x128xf32>
    %146 = vector.extract_strided_slice %128 {offsets = [0, 256], sizes = [16, 128], strides = [1, 1]} : vector<16x384xf32> to vector<16x128xf32>
    %147 = arith.addf %146, %8 : vector<16x128xf32>
    %148 = arith.mulf %136, %147 : vector<16x128xf32>
    %149 = arith.addf %145, %148 : vector<16x128xf32>
    %150 = math.tanh %149 : vector<16x128xf32>
    %cst_32 = arith.constant 1.000000e+00 : f32
    %151 = vector.broadcast %cst_32 : f32 to vector<16x128xf32>
    %152 = arith.subf %151, %144 : vector<16x128xf32>
    %153 = arith.mulf %152, %150 : vector<16x128xf32>
    %154 = arith.mulf %144, %123 : vector<16x128xf32>
    %155 = arith.addf %153, %154 : vector<16x128xf32>
    %c3_i32 = arith.constant 3 : i32
    %156 = arith.addi %9, %c3_i32 : i32
    %157 = vector.broadcast %156 : i32 to vector<16x1xi32>
    %158 = arith.cmpi sgt, %5, %157 : vector<16x1xi32>
    %159 = vector.shape_cast %158 : vector<16x1xi1> to vector<16x1xi1>
    %160 = vector.broadcast %159 : vector<16x1xi1> to vector<16x128xi1>
    %161 = arith.select %160, %155, %123 : vector<16x128xi1>, vector<16x128xf32>
    %c4 = arith.constant 4 : index
    %c0_33 = arith.constant 0 : index
    %c0_34 = arith.constant 0 : index
    %162 = vector.load %arg2[%c4, %c0_33, %c0_34] : memref<12x16x384xbf16, #tpu.memory_space<vmem>>, vector<1x16x384xbf16>
    %163 = vector.shape_cast %162 : vector<1x16x384xbf16> to vector<16x384xbf16>
    %164 = arith.extf %163 : vector<16x384xbf16> to vector<16x384xf32>
    %165 = arith.truncf %161 : vector<16x128xf32> to vector<16x128xbf16>
    %cst_35 = arith.constant dense<0.000000e+00> : vector<16x384xf32>
    %166 = tpu.matmul %165, %4, %cst_35 {dimension_numbers = #tpu.dot_dimension_numbers<[1], [0], [0], [1], [0, 0, 1, 1], [], []>} : vector<16x128xbf16>, vector<128x384xbf16>, vector<16x384xf32> -> vector<16x384xf32>
    %167 = vector.extract_strided_slice %164 {offsets = [0, 0], sizes = [16, 128], strides = [1, 1]} : vector<16x384xf32> to vector<16x128xf32>
    %168 = vector.extract_strided_slice %166 {offsets = [0, 0], sizes = [16, 128], strides = [1, 1]} : vector<16x384xf32> to vector<16x128xf32>
    %169 = arith.addf %167, %168 : vector<16x128xf32>
    %170 = arith.negf %169 : vector<16x128xf32>
    %171 = math.exp %170 : vector<16x128xf32>
    %cst_36 = arith.constant 1.000000e+00 : f32
    %172 = vector.broadcast %cst_36 : f32 to vector<16x128xf32>
    %173 = arith.addf %172, %171 : vector<16x128xf32>
    %174 = arith.divf %172, %173 : vector<16x128xf32>
    %175 = vector.extract_strided_slice %164 {offsets = [0, 128], sizes = [16, 128], strides = [1, 1]} : vector<16x384xf32> to vector<16x128xf32>
    %176 = vector.extract_strided_slice %166 {offsets = [0, 128], sizes = [16, 128], strides = [1, 1]} : vector<16x384xf32> to vector<16x128xf32>
    %177 = arith.addf %175, %176 : vector<16x128xf32>
    %178 = arith.negf %177 : vector<16x128xf32>
    %179 = math.exp %178 : vector<16x128xf32>
    %cst_37 = arith.constant 1.000000e+00 : f32
    %180 = vector.broadcast %cst_37 : f32 to vector<16x128xf32>
    %181 = arith.addf %180, %179 : vector<16x128xf32>
    %182 = arith.divf %180, %181 : vector<16x128xf32>
    %183 = vector.extract_strided_slice %164 {offsets = [0, 256], sizes = [16, 128], strides = [1, 1]} : vector<16x384xf32> to vector<16x128xf32>
    %184 = vector.extract_strided_slice %166 {offsets = [0, 256], sizes = [16, 128], strides = [1, 1]} : vector<16x384xf32> to vector<16x128xf32>
    %185 = arith.addf %184, %8 : vector<16x128xf32>
    %186 = arith.mulf %174, %185 : vector<16x128xf32>
    %187 = arith.addf %183, %186 : vector<16x128xf32>
    %188 = math.tanh %187 : vector<16x128xf32>
    %cst_38 = arith.constant 1.000000e+00 : f32
    %189 = vector.broadcast %cst_38 : f32 to vector<16x128xf32>
    %190 = arith.subf %189, %182 : vector<16x128xf32>
    %191 = arith.mulf %190, %188 : vector<16x128xf32>
    %192 = arith.mulf %182, %161 : vector<16x128xf32>
    %193 = arith.addf %191, %192 : vector<16x128xf32>
    %c4_i32 = arith.constant 4 : i32
    %194 = arith.addi %9, %c4_i32 : i32
    %195 = vector.broadcast %194 : i32 to vector<16x1xi32>
    %196 = arith.cmpi sgt, %5, %195 : vector<16x1xi32>
    %197 = vector.shape_cast %196 : vector<16x1xi1> to vector<16x1xi1>
    %198 = vector.broadcast %197 : vector<16x1xi1> to vector<16x128xi1>
    %199 = arith.select %198, %193, %161 : vector<16x128xi1>, vector<16x128xf32>
    %c5 = arith.constant 5 : index
    %c0_39 = arith.constant 0 : index
    %c0_40 = arith.constant 0 : index
    %200 = vector.load %arg2[%c5, %c0_39, %c0_40] : memref<12x16x384xbf16, #tpu.memory_space<vmem>>, vector<1x16x384xbf16>
    %201 = vector.shape_cast %200 : vector<1x16x384xbf16> to vector<16x384xbf16>
    %202 = arith.extf %201 : vector<16x384xbf16> to vector<16x384xf32>
    %203 = arith.truncf %199 : vector<16x128xf32> to vector<16x128xbf16>
    %cst_41 = arith.constant dense<0.000000e+00> : vector<16x384xf32>
    %204 = tpu.matmul %203, %4, %cst_41 {dimension_numbers = #tpu.dot_dimension_numbers<[1], [0], [0], [1], [0, 0, 1, 1], [], []>} : vector<16x128xbf16>, vector<128x384xbf16>, vector<16x384xf32> -> vector<16x384xf32>
    %205 = vector.extract_strided_slice %202 {offsets = [0, 0], sizes = [16, 128], strides = [1, 1]} : vector<16x384xf32> to vector<16x128xf32>
    %206 = vector.extract_strided_slice %204 {offsets = [0, 0], sizes = [16, 128], strides = [1, 1]} : vector<16x384xf32> to vector<16x128xf32>
    %207 = arith.addf %205, %206 : vector<16x128xf32>
    %208 = arith.negf %207 : vector<16x128xf32>
    %209 = math.exp %208 : vector<16x128xf32>
    %cst_42 = arith.constant 1.000000e+00 : f32
    %210 = vector.broadcast %cst_42 : f32 to vector<16x128xf32>
    %211 = arith.addf %210, %209 : vector<16x128xf32>
    %212 = arith.divf %210, %211 : vector<16x128xf32>
    %213 = vector.extract_strided_slice %202 {offsets = [0, 128], sizes = [16, 128], strides = [1, 1]} : vector<16x384xf32> to vector<16x128xf32>
    %214 = vector.extract_strided_slice %204 {offsets = [0, 128], sizes = [16, 128], strides = [1, 1]} : vector<16x384xf32> to vector<16x128xf32>
    %215 = arith.addf %213, %214 : vector<16x128xf32>
    %216 = arith.negf %215 : vector<16x128xf32>
    %217 = math.exp %216 : vector<16x128xf32>
    %cst_43 = arith.constant 1.000000e+00 : f32
    %218 = vector.broadcast %cst_43 : f32 to vector<16x128xf32>
    %219 = arith.addf %218, %217 : vector<16x128xf32>
    %220 = arith.divf %218, %219 : vector<16x128xf32>
    %221 = vector.extract_strided_slice %202 {offsets = [0, 256], sizes = [16, 128], strides = [1, 1]} : vector<16x384xf32> to vector<16x128xf32>
    %222 = vector.extract_strided_slice %204 {offsets = [0, 256], sizes = [16, 128], strides = [1, 1]} : vector<16x384xf32> to vector<16x128xf32>
    %223 = arith.addf %222, %8 : vector<16x128xf32>
    %224 = arith.mulf %212, %223 : vector<16x128xf32>
    %225 = arith.addf %221, %224 : vector<16x128xf32>
    %226 = math.tanh %225 : vector<16x128xf32>
    %cst_44 = arith.constant 1.000000e+00 : f32
    %227 = vector.broadcast %cst_44 : f32 to vector<16x128xf32>
    %228 = arith.subf %227, %220 : vector<16x128xf32>
    %229 = arith.mulf %228, %226 : vector<16x128xf32>
    %230 = arith.mulf %220, %199 : vector<16x128xf32>
    %231 = arith.addf %229, %230 : vector<16x128xf32>
    %c5_i32 = arith.constant 5 : i32
    %232 = arith.addi %9, %c5_i32 : i32
    %233 = vector.broadcast %232 : i32 to vector<16x1xi32>
    %234 = arith.cmpi sgt, %5, %233 : vector<16x1xi32>
    %235 = vector.shape_cast %234 : vector<16x1xi1> to vector<16x1xi1>
    %236 = vector.broadcast %235 : vector<16x1xi1> to vector<16x128xi1>
    %237 = arith.select %236, %231, %199 : vector<16x128xi1>, vector<16x128xf32>
    %c6 = arith.constant 6 : index
    %c0_45 = arith.constant 0 : index
    %c0_46 = arith.constant 0 : index
    %238 = vector.load %arg2[%c6, %c0_45, %c0_46] : memref<12x16x384xbf16, #tpu.memory_space<vmem>>, vector<1x16x384xbf16>
    %239 = vector.shape_cast %238 : vector<1x16x384xbf16> to vector<16x384xbf16>
    %240 = arith.extf %239 : vector<16x384xbf16> to vector<16x384xf32>
    %241 = arith.truncf %237 : vector<16x128xf32> to vector<16x128xbf16>
    %cst_47 = arith.constant dense<0.000000e+00> : vector<16x384xf32>
    %242 = tpu.matmul %241, %4, %cst_47 {dimension_numbers = #tpu.dot_dimension_numbers<[1], [0], [0], [1], [0, 0, 1, 1], [], []>} : vector<16x128xbf16>, vector<128x384xbf16>, vector<16x384xf32> -> vector<16x384xf32>
    %243 = vector.extract_strided_slice %240 {offsets = [0, 0], sizes = [16, 128], strides = [1, 1]} : vector<16x384xf32> to vector<16x128xf32>
    %244 = vector.extract_strided_slice %242 {offsets = [0, 0], sizes = [16, 128], strides = [1, 1]} : vector<16x384xf32> to vector<16x128xf32>
    %245 = arith.addf %243, %244 : vector<16x128xf32>
    %246 = arith.negf %245 : vector<16x128xf32>
    %247 = math.exp %246 : vector<16x128xf32>
    %cst_48 = arith.constant 1.000000e+00 : f32
    %248 = vector.broadcast %cst_48 : f32 to vector<16x128xf32>
    %249 = arith.addf %248, %247 : vector<16x128xf32>
    %250 = arith.divf %248, %249 : vector<16x128xf32>
    %251 = vector.extract_strided_slice %240 {offsets = [0, 128], sizes = [16, 128], strides = [1, 1]} : vector<16x384xf32> to vector<16x128xf32>
    %252 = vector.extract_strided_slice %242 {offsets = [0, 128], sizes = [16, 128], strides = [1, 1]} : vector<16x384xf32> to vector<16x128xf32>
    %253 = arith.addf %251, %252 : vector<16x128xf32>
    %254 = arith.negf %253 : vector<16x128xf32>
    %255 = math.exp %254 : vector<16x128xf32>
    %cst_49 = arith.constant 1.000000e+00 : f32
    %256 = vector.broadcast %cst_49 : f32 to vector<16x128xf32>
    %257 = arith.addf %256, %255 : vector<16x128xf32>
    %258 = arith.divf %256, %257 : vector<16x128xf32>
    %259 = vector.extract_strided_slice %240 {offsets = [0, 256], sizes = [16, 128], strides = [1, 1]} : vector<16x384xf32> to vector<16x128xf32>
    %260 = vector.extract_strided_slice %242 {offsets = [0, 256], sizes = [16, 128], strides = [1, 1]} : vector<16x384xf32> to vector<16x128xf32>
    %261 = arith.addf %260, %8 : vector<16x128xf32>
    %262 = arith.mulf %250, %261 : vector<16x128xf32>
    %263 = arith.addf %259, %262 : vector<16x128xf32>
    %264 = math.tanh %263 : vector<16x128xf32>
    %cst_50 = arith.constant 1.000000e+00 : f32
    %265 = vector.broadcast %cst_50 : f32 to vector<16x128xf32>
    %266 = arith.subf %265, %258 : vector<16x128xf32>
    %267 = arith.mulf %266, %264 : vector<16x128xf32>
    %268 = arith.mulf %258, %237 : vector<16x128xf32>
    %269 = arith.addf %267, %268 : vector<16x128xf32>
    %c6_i32 = arith.constant 6 : i32
    %270 = arith.addi %9, %c6_i32 : i32
    %271 = vector.broadcast %270 : i32 to vector<16x1xi32>
    %272 = arith.cmpi sgt, %5, %271 : vector<16x1xi32>
    %273 = vector.shape_cast %272 : vector<16x1xi1> to vector<16x1xi1>
    %274 = vector.broadcast %273 : vector<16x1xi1> to vector<16x128xi1>
    %275 = arith.select %274, %269, %237 : vector<16x128xi1>, vector<16x128xf32>
    %c7 = arith.constant 7 : index
    %c0_51 = arith.constant 0 : index
    %c0_52 = arith.constant 0 : index
    %276 = vector.load %arg2[%c7, %c0_51, %c0_52] : memref<12x16x384xbf16, #tpu.memory_space<vmem>>, vector<1x16x384xbf16>
    %277 = vector.shape_cast %276 : vector<1x16x384xbf16> to vector<16x384xbf16>
    %278 = arith.extf %277 : vector<16x384xbf16> to vector<16x384xf32>
    %279 = arith.truncf %275 : vector<16x128xf32> to vector<16x128xbf16>
    %cst_53 = arith.constant dense<0.000000e+00> : vector<16x384xf32>
    %280 = tpu.matmul %279, %4, %cst_53 {dimension_numbers = #tpu.dot_dimension_numbers<[1], [0], [0], [1], [0, 0, 1, 1], [], []>} : vector<16x128xbf16>, vector<128x384xbf16>, vector<16x384xf32> -> vector<16x384xf32>
    %281 = vector.extract_strided_slice %278 {offsets = [0, 0], sizes = [16, 128], strides = [1, 1]} : vector<16x384xf32> to vector<16x128xf32>
    %282 = vector.extract_strided_slice %280 {offsets = [0, 0], sizes = [16, 128], strides = [1, 1]} : vector<16x384xf32> to vector<16x128xf32>
    %283 = arith.addf %281, %282 : vector<16x128xf32>
    %284 = arith.negf %283 : vector<16x128xf32>
    %285 = math.exp %284 : vector<16x128xf32>
    %cst_54 = arith.constant 1.000000e+00 : f32
    %286 = vector.broadcast %cst_54 : f32 to vector<16x128xf32>
    %287 = arith.addf %286, %285 : vector<16x128xf32>
    %288 = arith.divf %286, %287 : vector<16x128xf32>
    %289 = vector.extract_strided_slice %278 {offsets = [0, 128], sizes = [16, 128], strides = [1, 1]} : vector<16x384xf32> to vector<16x128xf32>
    %290 = vector.extract_strided_slice %280 {offsets = [0, 128], sizes = [16, 128], strides = [1, 1]} : vector<16x384xf32> to vector<16x128xf32>
    %291 = arith.addf %289, %290 : vector<16x128xf32>
    %292 = arith.negf %291 : vector<16x128xf32>
    %293 = math.exp %292 : vector<16x128xf32>
    %cst_55 = arith.constant 1.000000e+00 : f32
    %294 = vector.broadcast %cst_55 : f32 to vector<16x128xf32>
    %295 = arith.addf %294, %293 : vector<16x128xf32>
    %296 = arith.divf %294, %295 : vector<16x128xf32>
    %297 = vector.extract_strided_slice %278 {offsets = [0, 256], sizes = [16, 128], strides = [1, 1]} : vector<16x384xf32> to vector<16x128xf32>
    %298 = vector.extract_strided_slice %280 {offsets = [0, 256], sizes = [16, 128], strides = [1, 1]} : vector<16x384xf32> to vector<16x128xf32>
    %299 = arith.addf %298, %8 : vector<16x128xf32>
    %300 = arith.mulf %288, %299 : vector<16x128xf32>
    %301 = arith.addf %297, %300 : vector<16x128xf32>
    %302 = math.tanh %301 : vector<16x128xf32>
    %cst_56 = arith.constant 1.000000e+00 : f32
    %303 = vector.broadcast %cst_56 : f32 to vector<16x128xf32>
    %304 = arith.subf %303, %296 : vector<16x128xf32>
    %305 = arith.mulf %304, %302 : vector<16x128xf32>
    %306 = arith.mulf %296, %275 : vector<16x128xf32>
    %307 = arith.addf %305, %306 : vector<16x128xf32>
    %c7_i32 = arith.constant 7 : i32
    %308 = arith.addi %9, %c7_i32 : i32
    %309 = vector.broadcast %308 : i32 to vector<16x1xi32>
    %310 = arith.cmpi sgt, %5, %309 : vector<16x1xi32>
    %311 = vector.shape_cast %310 : vector<16x1xi1> to vector<16x1xi1>
    %312 = vector.broadcast %311 : vector<16x1xi1> to vector<16x128xi1>
    %313 = arith.select %312, %307, %275 : vector<16x128xi1>, vector<16x128xf32>
    %c8 = arith.constant 8 : index
    %c0_57 = arith.constant 0 : index
    %c0_58 = arith.constant 0 : index
    %314 = vector.load %arg2[%c8, %c0_57, %c0_58] : memref<12x16x384xbf16, #tpu.memory_space<vmem>>, vector<1x16x384xbf16>
    %315 = vector.shape_cast %314 : vector<1x16x384xbf16> to vector<16x384xbf16>
    %316 = arith.extf %315 : vector<16x384xbf16> to vector<16x384xf32>
    %317 = arith.truncf %313 : vector<16x128xf32> to vector<16x128xbf16>
    %cst_59 = arith.constant dense<0.000000e+00> : vector<16x384xf32>
    %318 = tpu.matmul %317, %4, %cst_59 {dimension_numbers = #tpu.dot_dimension_numbers<[1], [0], [0], [1], [0, 0, 1, 1], [], []>} : vector<16x128xbf16>, vector<128x384xbf16>, vector<16x384xf32> -> vector<16x384xf32>
    %319 = vector.extract_strided_slice %316 {offsets = [0, 0], sizes = [16, 128], strides = [1, 1]} : vector<16x384xf32> to vector<16x128xf32>
    %320 = vector.extract_strided_slice %318 {offsets = [0, 0], sizes = [16, 128], strides = [1, 1]} : vector<16x384xf32> to vector<16x128xf32>
    %321 = arith.addf %319, %320 : vector<16x128xf32>
    %322 = arith.negf %321 : vector<16x128xf32>
    %323 = math.exp %322 : vector<16x128xf32>
    %cst_60 = arith.constant 1.000000e+00 : f32
    %324 = vector.broadcast %cst_60 : f32 to vector<16x128xf32>
    %325 = arith.addf %324, %323 : vector<16x128xf32>
    %326 = arith.divf %324, %325 : vector<16x128xf32>
    %327 = vector.extract_strided_slice %316 {offsets = [0, 128], sizes = [16, 128], strides = [1, 1]} : vector<16x384xf32> to vector<16x128xf32>
    %328 = vector.extract_strided_slice %318 {offsets = [0, 128], sizes = [16, 128], strides = [1, 1]} : vector<16x384xf32> to vector<16x128xf32>
    %329 = arith.addf %327, %328 : vector<16x128xf32>
    %330 = arith.negf %329 : vector<16x128xf32>
    %331 = math.exp %330 : vector<16x128xf32>
    %cst_61 = arith.constant 1.000000e+00 : f32
    %332 = vector.broadcast %cst_61 : f32 to vector<16x128xf32>
    %333 = arith.addf %332, %331 : vector<16x128xf32>
    %334 = arith.divf %332, %333 : vector<16x128xf32>
    %335 = vector.extract_strided_slice %316 {offsets = [0, 256], sizes = [16, 128], strides = [1, 1]} : vector<16x384xf32> to vector<16x128xf32>
    %336 = vector.extract_strided_slice %318 {offsets = [0, 256], sizes = [16, 128], strides = [1, 1]} : vector<16x384xf32> to vector<16x128xf32>
    %337 = arith.addf %336, %8 : vector<16x128xf32>
    %338 = arith.mulf %326, %337 : vector<16x128xf32>
    %339 = arith.addf %335, %338 : vector<16x128xf32>
    %340 = math.tanh %339 : vector<16x128xf32>
    %cst_62 = arith.constant 1.000000e+00 : f32
    %341 = vector.broadcast %cst_62 : f32 to vector<16x128xf32>
    %342 = arith.subf %341, %334 : vector<16x128xf32>
    %343 = arith.mulf %342, %340 : vector<16x128xf32>
    %344 = arith.mulf %334, %313 : vector<16x128xf32>
    %345 = arith.addf %343, %344 : vector<16x128xf32>
    %c8_i32 = arith.constant 8 : i32
    %346 = arith.addi %9, %c8_i32 : i32
    %347 = vector.broadcast %346 : i32 to vector<16x1xi32>
    %348 = arith.cmpi sgt, %5, %347 : vector<16x1xi32>
    %349 = vector.shape_cast %348 : vector<16x1xi1> to vector<16x1xi1>
    %350 = vector.broadcast %349 : vector<16x1xi1> to vector<16x128xi1>
    %351 = arith.select %350, %345, %313 : vector<16x128xi1>, vector<16x128xf32>
    %c9 = arith.constant 9 : index
    %c0_63 = arith.constant 0 : index
    %c0_64 = arith.constant 0 : index
    %352 = vector.load %arg2[%c9, %c0_63, %c0_64] : memref<12x16x384xbf16, #tpu.memory_space<vmem>>, vector<1x16x384xbf16>
    %353 = vector.shape_cast %352 : vector<1x16x384xbf16> to vector<16x384xbf16>
    %354 = arith.extf %353 : vector<16x384xbf16> to vector<16x384xf32>
    %355 = arith.truncf %351 : vector<16x128xf32> to vector<16x128xbf16>
    %cst_65 = arith.constant dense<0.000000e+00> : vector<16x384xf32>
    %356 = tpu.matmul %355, %4, %cst_65 {dimension_numbers = #tpu.dot_dimension_numbers<[1], [0], [0], [1], [0, 0, 1, 1], [], []>} : vector<16x128xbf16>, vector<128x384xbf16>, vector<16x384xf32> -> vector<16x384xf32>
    %357 = vector.extract_strided_slice %354 {offsets = [0, 0], sizes = [16, 128], strides = [1, 1]} : vector<16x384xf32> to vector<16x128xf32>
    %358 = vector.extract_strided_slice %356 {offsets = [0, 0], sizes = [16, 128], strides = [1, 1]} : vector<16x384xf32> to vector<16x128xf32>
    %359 = arith.addf %357, %358 : vector<16x128xf32>
    %360 = arith.negf %359 : vector<16x128xf32>
    %361 = math.exp %360 : vector<16x128xf32>
    %cst_66 = arith.constant 1.000000e+00 : f32
    %362 = vector.broadcast %cst_66 : f32 to vector<16x128xf32>
    %363 = arith.addf %362, %361 : vector<16x128xf32>
    %364 = arith.divf %362, %363 : vector<16x128xf32>
    %365 = vector.extract_strided_slice %354 {offsets = [0, 128], sizes = [16, 128], strides = [1, 1]} : vector<16x384xf32> to vector<16x128xf32>
    %366 = vector.extract_strided_slice %356 {offsets = [0, 128], sizes = [16, 128], strides = [1, 1]} : vector<16x384xf32> to vector<16x128xf32>
    %367 = arith.addf %365, %366 : vector<16x128xf32>
    %368 = arith.negf %367 : vector<16x128xf32>
    %369 = math.exp %368 : vector<16x128xf32>
    %cst_67 = arith.constant 1.000000e+00 : f32
    %370 = vector.broadcast %cst_67 : f32 to vector<16x128xf32>
    %371 = arith.addf %370, %369 : vector<16x128xf32>
    %372 = arith.divf %370, %371 : vector<16x128xf32>
    %373 = vector.extract_strided_slice %354 {offsets = [0, 256], sizes = [16, 128], strides = [1, 1]} : vector<16x384xf32> to vector<16x128xf32>
    %374 = vector.extract_strided_slice %356 {offsets = [0, 256], sizes = [16, 128], strides = [1, 1]} : vector<16x384xf32> to vector<16x128xf32>
    %375 = arith.addf %374, %8 : vector<16x128xf32>
    %376 = arith.mulf %364, %375 : vector<16x128xf32>
    %377 = arith.addf %373, %376 : vector<16x128xf32>
    %378 = math.tanh %377 : vector<16x128xf32>
    %cst_68 = arith.constant 1.000000e+00 : f32
    %379 = vector.broadcast %cst_68 : f32 to vector<16x128xf32>
    %380 = arith.subf %379, %372 : vector<16x128xf32>
    %381 = arith.mulf %380, %378 : vector<16x128xf32>
    %382 = arith.mulf %372, %351 : vector<16x128xf32>
    %383 = arith.addf %381, %382 : vector<16x128xf32>
    %c9_i32 = arith.constant 9 : i32
    %384 = arith.addi %9, %c9_i32 : i32
    %385 = vector.broadcast %384 : i32 to vector<16x1xi32>
    %386 = arith.cmpi sgt, %5, %385 : vector<16x1xi32>
    %387 = vector.shape_cast %386 : vector<16x1xi1> to vector<16x1xi1>
    %388 = vector.broadcast %387 : vector<16x1xi1> to vector<16x128xi1>
    %389 = arith.select %388, %383, %351 : vector<16x128xi1>, vector<16x128xf32>
    %c10 = arith.constant 10 : index
    %c0_69 = arith.constant 0 : index
    %c0_70 = arith.constant 0 : index
    %390 = vector.load %arg2[%c10, %c0_69, %c0_70] : memref<12x16x384xbf16, #tpu.memory_space<vmem>>, vector<1x16x384xbf16>
    %391 = vector.shape_cast %390 : vector<1x16x384xbf16> to vector<16x384xbf16>
    %392 = arith.extf %391 : vector<16x384xbf16> to vector<16x384xf32>
    %393 = arith.truncf %389 : vector<16x128xf32> to vector<16x128xbf16>
    %cst_71 = arith.constant dense<0.000000e+00> : vector<16x384xf32>
    %394 = tpu.matmul %393, %4, %cst_71 {dimension_numbers = #tpu.dot_dimension_numbers<[1], [0], [0], [1], [0, 0, 1, 1], [], []>} : vector<16x128xbf16>, vector<128x384xbf16>, vector<16x384xf32> -> vector<16x384xf32>
    %395 = vector.extract_strided_slice %392 {offsets = [0, 0], sizes = [16, 128], strides = [1, 1]} : vector<16x384xf32> to vector<16x128xf32>
    %396 = vector.extract_strided_slice %394 {offsets = [0, 0], sizes = [16, 128], strides = [1, 1]} : vector<16x384xf32> to vector<16x128xf32>
    %397 = arith.addf %395, %396 : vector<16x128xf32>
    %398 = arith.negf %397 : vector<16x128xf32>
    %399 = math.exp %398 : vector<16x128xf32>
    %cst_72 = arith.constant 1.000000e+00 : f32
    %400 = vector.broadcast %cst_72 : f32 to vector<16x128xf32>
    %401 = arith.addf %400, %399 : vector<16x128xf32>
    %402 = arith.divf %400, %401 : vector<16x128xf32>
    %403 = vector.extract_strided_slice %392 {offsets = [0, 128], sizes = [16, 128], strides = [1, 1]} : vector<16x384xf32> to vector<16x128xf32>
    %404 = vector.extract_strided_slice %394 {offsets = [0, 128], sizes = [16, 128], strides = [1, 1]} : vector<16x384xf32> to vector<16x128xf32>
    %405 = arith.addf %403, %404 : vector<16x128xf32>
    %406 = arith.negf %405 : vector<16x128xf32>
    %407 = math.exp %406 : vector<16x128xf32>
    %cst_73 = arith.constant 1.000000e+00 : f32
    %408 = vector.broadcast %cst_73 : f32 to vector<16x128xf32>
    %409 = arith.addf %408, %407 : vector<16x128xf32>
    %410 = arith.divf %408, %409 : vector<16x128xf32>
    %411 = vector.extract_strided_slice %392 {offsets = [0, 256], sizes = [16, 128], strides = [1, 1]} : vector<16x384xf32> to vector<16x128xf32>
    %412 = vector.extract_strided_slice %394 {offsets = [0, 256], sizes = [16, 128], strides = [1, 1]} : vector<16x384xf32> to vector<16x128xf32>
    %413 = arith.addf %412, %8 : vector<16x128xf32>
    %414 = arith.mulf %402, %413 : vector<16x128xf32>
    %415 = arith.addf %411, %414 : vector<16x128xf32>
    %416 = math.tanh %415 : vector<16x128xf32>
    %cst_74 = arith.constant 1.000000e+00 : f32
    %417 = vector.broadcast %cst_74 : f32 to vector<16x128xf32>
    %418 = arith.subf %417, %410 : vector<16x128xf32>
    %419 = arith.mulf %418, %416 : vector<16x128xf32>
    %420 = arith.mulf %410, %389 : vector<16x128xf32>
    %421 = arith.addf %419, %420 : vector<16x128xf32>
    %c10_i32 = arith.constant 10 : i32
    %422 = arith.addi %9, %c10_i32 : i32
    %423 = vector.broadcast %422 : i32 to vector<16x1xi32>
    %424 = arith.cmpi sgt, %5, %423 : vector<16x1xi32>
    %425 = vector.shape_cast %424 : vector<16x1xi1> to vector<16x1xi1>
    %426 = vector.broadcast %425 : vector<16x1xi1> to vector<16x128xi1>
    %427 = arith.select %426, %421, %389 : vector<16x128xi1>, vector<16x128xf32>
    %c11 = arith.constant 11 : index
    %c0_75 = arith.constant 0 : index
    %c0_76 = arith.constant 0 : index
    %428 = vector.load %arg2[%c11, %c0_75, %c0_76] : memref<12x16x384xbf16, #tpu.memory_space<vmem>>, vector<1x16x384xbf16>
    %429 = vector.shape_cast %428 : vector<1x16x384xbf16> to vector<16x384xbf16>
    %430 = arith.extf %429 : vector<16x384xbf16> to vector<16x384xf32>
    %431 = arith.truncf %427 : vector<16x128xf32> to vector<16x128xbf16>
    %cst_77 = arith.constant dense<0.000000e+00> : vector<16x384xf32>
    %432 = tpu.matmul %431, %4, %cst_77 {dimension_numbers = #tpu.dot_dimension_numbers<[1], [0], [0], [1], [0, 0, 1, 1], [], []>} : vector<16x128xbf16>, vector<128x384xbf16>, vector<16x384xf32> -> vector<16x384xf32>
    %433 = vector.extract_strided_slice %430 {offsets = [0, 0], sizes = [16, 128], strides = [1, 1]} : vector<16x384xf32> to vector<16x128xf32>
    %434 = vector.extract_strided_slice %432 {offsets = [0, 0], sizes = [16, 128], strides = [1, 1]} : vector<16x384xf32> to vector<16x128xf32>
    %435 = arith.addf %433, %434 : vector<16x128xf32>
    %436 = arith.negf %435 : vector<16x128xf32>
    %437 = math.exp %436 : vector<16x128xf32>
    %cst_78 = arith.constant 1.000000e+00 : f32
    %438 = vector.broadcast %cst_78 : f32 to vector<16x128xf32>
    %439 = arith.addf %438, %437 : vector<16x128xf32>
    %440 = arith.divf %438, %439 : vector<16x128xf32>
    %441 = vector.extract_strided_slice %430 {offsets = [0, 128], sizes = [16, 128], strides = [1, 1]} : vector<16x384xf32> to vector<16x128xf32>
    %442 = vector.extract_strided_slice %432 {offsets = [0, 128], sizes = [16, 128], strides = [1, 1]} : vector<16x384xf32> to vector<16x128xf32>
    %443 = arith.addf %441, %442 : vector<16x128xf32>
    %444 = arith.negf %443 : vector<16x128xf32>
    %445 = math.exp %444 : vector<16x128xf32>
    %cst_79 = arith.constant 1.000000e+00 : f32
    %446 = vector.broadcast %cst_79 : f32 to vector<16x128xf32>
    %447 = arith.addf %446, %445 : vector<16x128xf32>
    %448 = arith.divf %446, %447 : vector<16x128xf32>
    %449 = vector.extract_strided_slice %430 {offsets = [0, 256], sizes = [16, 128], strides = [1, 1]} : vector<16x384xf32> to vector<16x128xf32>
    %450 = vector.extract_strided_slice %432 {offsets = [0, 256], sizes = [16, 128], strides = [1, 1]} : vector<16x384xf32> to vector<16x128xf32>
    %451 = arith.addf %450, %8 : vector<16x128xf32>
    %452 = arith.mulf %440, %451 : vector<16x128xf32>
    %453 = arith.addf %449, %452 : vector<16x128xf32>
    %454 = math.tanh %453 : vector<16x128xf32>
    %cst_80 = arith.constant 1.000000e+00 : f32
    %455 = vector.broadcast %cst_80 : f32 to vector<16x128xf32>
    %456 = arith.subf %455, %448 : vector<16x128xf32>
    %457 = arith.mulf %456, %454 : vector<16x128xf32>
    %458 = arith.mulf %448, %427 : vector<16x128xf32>
    %459 = arith.addf %457, %458 : vector<16x128xf32>
    %c11_i32 = arith.constant 11 : i32
    %460 = arith.addi %9, %c11_i32 : i32
    %461 = vector.broadcast %460 : i32 to vector<16x1xi32>
    %462 = arith.cmpi sgt, %5, %461 : vector<16x1xi32>
    %463 = vector.shape_cast %462 : vector<16x1xi1> to vector<16x1xi1>
    %464 = vector.broadcast %463 : vector<16x1xi1> to vector<16x128xi1>
    %465 = arith.select %464, %459, %427 : vector<16x128xi1>, vector<16x128xf32>
    %c0_81 = arith.constant 0 : index
    %c0_82 = arith.constant 0 : index
    %466 = vector.load %arg6[%c0_81, %c0_82] : memref<16x128xf32, #tpu.memory_space<vmem>>, vector<16x128xf32>
    tpu.vector_store %arg6[%c0_81, %c0_82], %465 {strides = array<i32>} : memref<16x128xf32, #tpu.memory_space<vmem>>, vector<16x128xf32>,
    return
  }
  func.func @transform_0(%arg0: i32, %arg1: i32) -> (i32, i32, i32) {
    %c0_i32 = arith.constant 0 : i32
    %c0_i32_0 = arith.constant 0 : i32
    return %arg1, %arg0, %c0_i32 : i32, i32, i32
  }
  func.func @transform_1(%arg0: i32, %arg1: i32) -> (i32, i32) {
    %c0_i32 = arith.constant 0 : i32
    %c0_i32_0 = arith.constant 0 : i32
    %c0_i32_1 = arith.constant 0 : i32
    return %c0_i32, %c0_i32_0 : i32, i32
  }
  func.func @transform_2(%arg0: i32, %arg1: i32) -> (i32, i32) {
    %c0_i32 = arith.constant 0 : i32
    %c0_i32_0 = arith.constant 0 : i32
    %c0_i32_1 = arith.constant 0 : i32
    return %c0_i32, %c0_i32_0 : i32, i32
  }
  func.func @transform_3(%arg0: i32, %arg1: i32) -> (i32, i32) {
    %c0_i32 = arith.constant 0 : i32
    %c0_i32_0 = arith.constant 0 : i32
    return %arg0, %c0_i32 : i32, i32
  }
  func.func @transform_4(%arg0: i32, %arg1: i32) -> (i32, i32) {
    %c0_i32 = arith.constant 0 : i32
    %c0_i32_0 = arith.constant 0 : i32
    return %arg0, %c0_i32 : i32, i32
  }
}

</mosaic_0001>

<bundles_post_ra>
// kernel: base_rnn_forward.1
= control target key start
LH: loop header
LB: loop body
LE: loop exit
PB: predicated region body
PF: predicated region fallthrough
CT: control target
= control target key end

     0   :  { %s3276_s15 = smov 0   ;;  %s3278_s16 = smov 0   ;;  %s4409_s0 = inlined_call_operand.vmem [shape: bf16[24,16,384], index: 0, kind: input, shape index: {}]   ;;  %s4410_s1 = inlined_call_operand.vmem [shape: bf16[128,384], index: 1, kind: input, shape index: {}]   ;;  %s4411_s2 = inlined_call_operand.vmem [shape: f32[1,128], index: 2, kind: input, shape index: {}]   ;;  %s4412_s3 = inlined_call_operand.vmem [shape: s32[16,1], index: 3, kind: input, shape index: {}]   ;;  %s4413_s4 = inlined_call_operand.vmem [shape: f32[16,128], index: 4, kind: output, shape index: {}]  }
   0x1   :  { %s3280_s17 = smov 0  }
   0x2 LB: > { %s23_s18 = sadd.s32 1, %s3241_s16  ;;  %p2398_p0 = scmp.ge.s32.totalorder %s3245_s17, 1  ;;  %s3245_s17 = sphi %s3280_s17, %s14_s17   ;;  %s3241_s16 = sphi %s3278_s16, %s4415_s16   ;;  %s3237_s15 = sphi %s3276_s15, %s4414_s15  }
   0x3   : > { %p24_p1 = scmp.ge.s32.totalorder %s23_s18, 2  ;;  %p195_p2 = scmp.lt.s32.totalorder %s3245_s17, 3 }
   0x5   : > { %s4417_s18 = smov (%p24_p1, %s23_s18), 0  ;;  %p196_p3 = pnand %p2398_p0, %p195_p2 }
   0x6   : > { %s3294_s19 = smul.u32 (!%p196_p3), 12, %s3237_s15  ;;  %p2400_p5 = scmp.ne.s32.totalorder (!%p196_p3), %s3237_s15, 0 }
   0x7   : > { %199 = sbr.rel (%p196_p3) target bundleno = 3223 (0xc97), region = 36 }
   0x8   : > { %p234_p4 = scmp.lt.s32.totalorder (!%p196_p3), %s3294_s19, 23 }
   0xe   : > { %s235_s20 = scalar_select %p234_p4, %s3294_s19, 23 }
   0xf   : > { %261 = sbr.rel (%p2400_p5) target bundleno = 22 (0x16), region = 40  ;;  %v3247_v0 = vmov (!%p2400_p5), 0.0  }
  0x10   : > { %s2870_s21 = smul.u32 24, %s235_s20  ;;  %262 = vst [vmem:[%s4413_s4] sm:$0xff] (!%p2400_p5), %v3247_v0  ;;  %263 = vst [vmem:[%s4413_s4 + $0x8] sm:$0xff] (!%p2400_p5), %v3247_v0 }
  0x12   : > { %s3301_s24 = scalar_lea.vmem %s4409_s0, %s2870_s21 }
  0x16 PF: > { %v3312_v1 = vld [vmem:[%s4410_s1 + $0x4] ss:$12 sps:$4 sm:$0xff]   ;;  %v3317_v2 = vld [vmem:[%s4410_s1] ss:$12 sps:$4 sm:$0xff]   ;;  %v3248_v3 = vmov 0.0   ;;  %v3249_v4 = vmov 0   ;;  %v575_v17 = vstv %s3294_s19 }
  0x17   : > { %2630 = vmatprep.subr.bf16.mxu1 %v3248_v3  ;;  %479 = vmatprep.mubr.bf16.mxu0 %v3249_v4  ;;  %v3325_v5 = vld [vmem:[%s4410_s1 + $0x1c] ss:$12 sps:$4 sm:$0xff]   ;;  %vm3250_vm0 = vmmov 0   ;;  %v3333_v6 = vld [vmem:[%s4410_s1 + $0x18] ss:$12 sps:$4 sm:$0xff]   ;;  %s886_s10 = sadd.s32 2, %s3294_s19 }
  0x18   : > { %447 = vmatprep.subr.bf16.mxu0 %v3312_v1  ;;  %2646 = vmatprep.mubr.msk.bf16.mxu1 %vm3250_vm0, %v3248_v3  ;;  %v3340_v7 = vld [vmem:[%s4410_s1 + $0x34] ss:$12 sps:$4 sm:$0xff]   ;;  %v3347_v8 = vld [vmem:[%s4410_s1 + $0x30] ss:$12 sps:$4 sm:$0xff]   ;;  %v3353_v9 = vld [vmem:[%s4410_s1 + $0x4c] ss:$12 sps:$4 sm:$0xff]   ;;  %v3432_v24 = vstv %s886_s10 }
  0x19   : > { %448 = vmatpush1.bf16.msra.mxu0 %v3317_v2  ;;  %2899 = vset.pattern.permute.xlu0 %v3249_v4  ;;  %v3358_v10 = vld [vmem:[%s4410_s1 + $0x8] ss:$12 sps:$4 sm:$0xff]   ;;  %v3371_v12 = vld [vmem:[%s4410_s1 + $0x64] ss:$12 sps:$4 sm:$0xff]   ;;  %v3377_v13 = vld [vmem:[%s4410_s1 + $0x20] ss:$12 sps:$4 sm:$0xff]  }
  0x1a   : > { %449 = vmatprep.subr.bf16.mxu0 %v3325_v5  ;;  %2900 = vset.pattern.permute.xlu1 %v3249_v4  ;;  %v3364_v11 = vld [vmem:[%s4410_s1 + $0x48] ss:$12 sps:$4 sm:$0xff]   ;;  %v3382_v14 = vld [vmem:[%s4410_s1 + $0x60] ss:$12 sps:$4 sm:$0xff]   ;;  %v3389_v15 = vld [vmem:[%s4410_s1 + $0x38] ss:$12 sps:$4 sm:$0xff]  }
  0x1b   : > { %2631 = vmatpush3.bf16.msra.mxu1 %v3358_v10  ;;  %v3395_v16 = vld [vmem:[%s4410_s1 + $0x7c] ss:$12 sps:$4 sm:$0xff]   ;;  %v3403_v18 = vld [vmem:[%s4410_s1 + $0x78] ss:$12 sps:$4 sm:$0xff]   ;;  %v3426_v22 = vld [vmem:[%s4410_s1 + $0x94] ss:$12 sps:$4 sm:$0xff]  }
  0x1c   : > { %2632 = vmatprep.subr.bf16.mxu1 %v3248_v3  ;;  %v3410_v19 = vld [vmem:[%s4410_s1 + $0x50] ss:$12 sps:$4 sm:$0xff]   ;;  %v3415_v20 = vld [vmem:[%s4412_s3] sm:$0xff]  ;;  %v3420_v21 = vld [vmem:[%s4412_s3 + $0x8] sm:$0xff]  ;;  %s1042_s26 = sadd.s32 3, %s3294_s19  ;;  %s1198_s9 = sadd.s32 4, %s3294_s19 }
  0x1d   : > { %450 = vmatpush1.bf16.msra.mxu0 %v3333_v6  ;;  %vm576_vm1 = vcmp.gt.s32.totalorder %v3415_v20, %v575_v17  ;;  %vm577_vm2 = vcmp.gt.s32.totalorder %v3420_v21, %v575_v17  ;;  %v3439_v25 = vld [vmem:[%s4410_s1 + $0x90] ss:$12 sps:$4 sm:$0xff]   ;;  %v3445_v26 = vld [vmem:[%s4410_s1 + $0x68] ss:$12 sps:$4 sm:$0xff]   ;;  %v3452_v28 = vld [vmem:[%s4410_s1 + $0xac] ss:$12 sps:$4 sm:$0xff]   ;;  %vm888_vm3 = vcmp.gt.s32.totalorder %v3415_v20, %v3432_v24  ;;  %v3457_v29 = vstv %s1042_s26 }
  0x1e   : > { %451 = vmatprep.subr.bf16.mxu0 %v3340_v7  ;;  %v578_v23 = vsel %vm576_vm1, 1, %v3249_v4  ;;  %v579_v27 = vsel %vm577_vm2, 1, %v3249_v4  ;;  %v3462_v30 = vld [vmem:[%s4410_s1 + $0xa8] ss:$12 sps:$4 sm:$0xff]   ;;  %v3469_v31 = vld [vmem:[%s4413_s4] sm:$0xff]  ;;  %v890_v34 = vsel %vm888_vm3, 1, %v3249_v4  ;;  %vm1044_vm4 = vcmp.gt.s32.totalorder %v3415_v20, %v3457_v29 }
  0x1f   : > { %2633 = vmatpush3.bf16.msra.mxu1 %v3377_v13  ;;  %581 = vperm.xlu0 %2899, %v578_v23   ;;  %v3474_v32 = vld [vmem:[%s4413_s4 + $0x8] sm:$0xff]  ;;  %v3487_v35 = vstv %s1198_s9  ;;  %s1354_s20 = sadd.s32 5, %s3294_s19  ;;  %v3497_v37 = vld [vmem:[%s4410_s1 + $0x98] ss:$12 sps:$4 sm:$0xff]   ;;  %v1046_v38 = vsel %vm1044_vm4, 1, %v3249_v4  ;;  %s1510_s23 = sadd.s32 6, %s3294_s19  ;;  %vm889_vm15 = vcmp.gt.s32.totalorder %v3420_v21, %v3432_v24  ;;  %vm1045_vm1 = vcmp.gt.s32.totalorder %v3420_v21, %v3457_v29 }
  0x20   : > { %2634 = vmatprep.subr.bf16.mxu1 %v3248_v3  ;;  %v3480_v33 = vld [vmem:[%s4410_s1 + $0x80] ss:$12 sps:$4 sm:$0xff]   ;;  %v318_v36 = vpack.c.bf16 %v3474_v32, %v3469_v31  ;;  %vm1200_vm5 = vcmp.gt.s32.totalorder %v3415_v20, %v3487_v35  ;;  %v3504_v39 = vstv %s1354_s20  ;;  %v3511_v40 = vld [vmem:[%s4410_s1 + $0xb0] ss:$12 sps:$4 sm:$0xff]   ;;  %v3519_v42 = vstv %s1510_s23  ;;  %s1666_s27 = sadd.s32 7, %s3294_s19  ;;  %s1822_s28 = sadd.s32 8, %s3294_s19 }
  0x21   : > { %452 = vmatpush1.bf16.msra.mxu0 %v3347_v8  ;;  %v1202_v41 = vsel %vm1200_vm5, 1, %v3249_v4  ;;  %vm1356_vm6 = vcmp.gt.s32.totalorder %v3415_v20, %v3504_v39  ;;  %vm1512_vm7 = vcmp.gt.s32.totalorder %v3415_v20, %v3519_v42  ;;  %v3530_v44 = vstv %s1666_s27  ;;  %s1978_s29 = sadd.s32 9, %s3294_s19  ;;  %s2134_s30 = sadd.s32 10, %s3294_s19  ;;  %v308_v24 = vld [vmem:[%s3301_s24] sm:$0xff] }
  0x22   : > { %453 = vmatprep.subr.bf16.mxu0 %v3353_v9  ;;  %v1358_v43 = vsel %vm1356_vm6, 1, %v3249_v4  ;;  %v1514_v45 = vsel %vm1512_vm7, 1, %v3249_v4  ;;  %vm1668_vm8 = vcmp.gt.s32.totalorder %v3415_v20, %v3530_v44  ;;  %v3540_v46 = vstv %s1822_s28  ;;  %s2290_s5 = sadd.s32 11, %s3294_s19  ;;  %s730_s6 = sadd.s32 1, %s3294_s19 }
  0x23   : > { %2635 = vmatpush3.bf16.msra.mxu1 %v3389_v15  ;;  %584 = vperm.xlu0 %2899, %v579_v27   ;;  %v1670_v47 = vsel %vm1668_vm8, 1, %v3249_v4  ;;  %vm1824_vm9 = vcmp.gt.s32.totalorder %v3415_v20, %v3540_v46  ;;  %v3552_v48 = vstv %s1978_s29  ;;  %v2135_v50 = vstv %s2134_s30  ;;  %v310_v27 = vld [vmem:[%s3301_s24 + $0xc] sm:$0xff] }
  0x24   : > { %2636 = vmatprep.subr.bf16.mxu1 %v3248_v3  ;;  %v1826_v49 = vsel %vm1824_vm9, 1, %v3249_v4  ;;  %vm1980_vm10 = vcmp.gt.s32.totalorder %v3415_v20, %v3552_v48  ;;  %vm2136_vm11 = vcmp.gt.s32.totalorder %v3415_v20, %v2135_v50  ;;  %v2291_v52 = vstv %s2290_s5 }
  0x25   : > { %454 = vmatpush1.bf16.msra.mxu0 %v3364_v11  ;;  %v1982_v51 = vsel %vm1980_vm10, 1, %v3249_v4  ;;  %v2138_v53 = vsel %vm2136_vm11, 1, %v3249_v4  ;;  %vm2292_vm12 = vcmp.gt.s32.totalorder %v3415_v20, %v2291_v52  ;;  %v731_v55 = vstv %s730_s6 }
  0x26   : > { %455 = vmatprep.subr.bf16.mxu0 %v3371_v12  ;;  %v2294_v54 = vsel %vm2292_vm12, 1, %v3249_v4  ;;  %vm732_vm13 = vcmp.gt.s32.totalorder %v3415_v20, %v731_v55  ;;  %vm733_vm14 = vcmp.gt.s32.totalorder %v3420_v21, %v731_v55  ;;  %v891_v58 = vsel %vm889_vm15, 1, %v3249_v4 }
  0x27   : > { %2637 = vmatpush3.bf16.msra.mxu1 %v3410_v19  ;;  %893 = vperm.xlu0 %2899, %v890_v34   ;;  %v734_v56 = vsel %vm732_vm13, 1, %v3249_v4  ;;  %v735_v57 = vsel %vm733_vm14, 1, %v3249_v4  ;;  %v1047_v59 = vsel %vm1045_vm1, 1, %v3249_v4  ;;  %vm1201_vm2 = vcmp.gt.s32.totalorder %v3420_v21, %v3487_v35 }
  0x28   : > { %2638 = vmatprep.subr.bf16.mxu1 %v3248_v3  ;;  %737 = vperm.xlu1 %2900, %v734_v56   ;;  %v1203_v60 = vsel %vm1201_vm2, 1, %v3249_v4  ;;  %vm1357_vm3 = vcmp.gt.s32.totalorder %v3420_v21, %v3504_v39  ;;  %vm1513_vm4 = vcmp.gt.s32.totalorder %v3420_v21, %v3519_v42  ;;  %vm1669_vm5 = vcmp.gt.s32.totalorder %v3420_v21, %v3530_v44 }
  0x29   : > { %456 = vmatpush1.bf16.msra.mxu0 %v3382_v14  ;;  %v1359_v61 = vsel %vm1357_vm3, 1, %v3249_v4  ;;  %v1515_v62 = vsel %vm1513_vm4, 1, %v3249_v4  ;;  %v1671_v63 = vsel %vm1669_vm5, 1, %v3249_v4  ;;  %vm1825_vm6 = vcmp.gt.s32.totalorder %v3420_v21, %v3540_v46 }
  0x2a   : > { %457 = vmatprep.subr.bf16.mxu0 %v3395_v16  ;;  %v1827_v0 = vsel %vm1825_vm6, 1, %v3249_v4  ;;  %vm1981_vm7 = vcmp.gt.s32.totalorder %v3420_v21, %v3552_v48  ;;  %vm2137_vm8 = vcmp.gt.s32.totalorder %v3420_v21, %v2135_v50  ;;  %vm2293_vm9 = vcmp.gt.s32.totalorder %v3420_v21, %v2291_v52 }
  0x2b   : > { %2639 = vmatpush3.bf16.msra.mxu1 %v3445_v26  ;;  %1049 = vperm.xlu0 %2899, %v1046_v38   ;;  %v1983_v17 = vsel %vm1981_vm7, 1, %v3249_v4  ;;  %v2139_v20 = vsel %vm2137_vm8, 1, %v3249_v4  ;;  %v2295_v23 = vsel %vm2293_vm9, 1, %v3249_v4  ;;  %v312_v29 = vunpack.c.l.bf16 %v308_v24 }
  0x2c   : > { %2640 = vmatprep.subr.bf16.mxu1 %v3248_v3  ;;  %740 = vperm.xlu1 %2900, %v735_v57   ;;  %v315_v34 = vunpack.c.l.bf16 %v310_v27  ;;  %v316_v42 = vunpack.c.h.bf16 %v310_v27 }
  0x2d   : > { %458 = vmatpush1.bf16.msra.mxu0 %v3403_v18 }
  0x2e   : > { %459 = vmatprep.subr.bf16.mxu0 %v3426_v22 }
  0x2f   : > { %2641 = vmatpush3.bf16.msra.mxu1 %v3480_v33  ;;  %1205 = vperm.xlu0 %2899, %v1202_v41  }
  0x30   : > { %2642 = vmatprep.subr.bf16.mxu1 %v3248_v3  ;;  %896 = vperm.xlu1 %2900, %v891_v58  }
  0x31   : > { %460 = vmatpush1.bf16.msra.mxu0 %v3439_v25 }
  0x32   : > { %461 = vmatprep.subr.bf16.mxu0 %v3452_v28 }
  0x33   : > { %2643 = vmatpush3.bf16.msra.mxu1 %v3497_v37  ;;  %1361 = vperm.xlu0 %2899, %v1358_v43  }
  0x34   : > { %2644 = vmatprep.subr.bf16.mxu1 %v3248_v3  ;;  %1052 = vperm.xlu1 %2900, %v1047_v59   ;;  %v3622_v59 = vld [vmem:[%s4411_s2] ss:$0 sm:$0xff] }
  0x35   : > { %462 = vmatpush1.bf16.msra.mxu0 %v3462_v30 }
  0x36   : > { %602 = vmatprep.subr.bf16.mxu0 %v3312_v1 }
  0x37   : > { %2645 = vmatpush3.bf16.msra.mxu1 %v3511_v40  ;;  %1517 = vperm.xlu0 %2899, %v1514_v45  }
  0x38   : > { %480 = vmatmul.mubr.bf16.vlgmr.msra.gmra.mrb[0].mxu0 %v318_v36  ;;  %2650 = vmatprep.subr.bf16.mxu1 %v3248_v3 }
  0x39   : > { %603 = vmatpush1.bf16.msra.mxu0 %v3317_v2  ;;  %634 = vmatprep.mubr.bf16.mxu0 %v3249_v4 }
  0x3a   : > { %604 = vmatprep.subr.bf16.mxu0 %v3325_v5  ;;  %2647 = vmatmul.mubr.bf16.vlgmr.msra.gmra.mrb[0].mxu1 %v318_v36  ;;  %v313_v36 = vunpack.c.h.bf16 %v308_v24 }
  0x3b   : > { %2651 = vmatpush3.bf16.msra.mxu1 %v3358_v10  ;;  %2666 = vmatprep.mubr.msk.bf16.mxu1 %vm3250_vm0, %v3248_v3 }
  0x3c   : > { %2652 = vmatprep.subr.bf16.mxu1 %v3248_v3  ;;  %1673 = vperm.xlu0 %2899, %v1670_v47  }
  0x3d   : > { %605 = vmatpush1.bf16.msra.mxu0 %v3333_v6  ;;  %1208 = vperm.xlu1 %2900, %v1203_v60  }
  0x3e   : > { %606 = vmatprep.subr.bf16.mxu0 %v3340_v7 }
  0x3f   : > { %2653 = vmatpush3.bf16.msra.mxu1 %v3377_v13 }
  0x40   : > { %2654 = vmatprep.subr.bf16.mxu1 %v3248_v3  ;;  %1829 = vperm.xlu0 %2899, %v1826_v49  }
  0x41   : > { %607 = vmatpush1.bf16.msra.mxu0 %v3347_v8  ;;  %1364 = vperm.xlu1 %2900, %v1359_v61   ;;  %v309_v61 = vld [vmem:[%s3301_s24 + $0x8] ss:$12 sps:$4 sm:$0xff]  }
  0x42   : > { %608 = vmatprep.subr.bf16.mxu0 %v3353_v9  ;;  %v317_v24 = vunpack.c.h.bf16 %v309_v61 }
  0x43   : > { %2655 = vmatpush3.bf16.msra.mxu1 %v3389_v15 }
  0x44   : > { %2656 = vmatprep.subr.bf16.mxu1 %v3248_v3  ;;  %1985 = vperm.xlu0 %2899, %v1982_v51  }
  0x45   : > { %609 = vmatpush1.bf16.msra.mxu0 %v3364_v11  ;;  %1520 = vperm.xlu1 %2900, %v1515_v62  }
  0x46   : > { %610 = vmatprep.subr.bf16.mxu0 %v3371_v12 }
  0x47   : > { %2657 = vmatpush3.bf16.msra.mxu1 %v3410_v19 }
  0x48   : > { %2658 = vmatprep.subr.bf16.mxu1 %v3248_v3  ;;  %2141 = vperm.xlu0 %2899, %v2138_v53  }
  0x49   : > { %611 = vmatpush1.bf16.msra.mxu0 %v3382_v14  ;;  %1676 = vperm.xlu1 %2900, %v1671_v63  }
  0x4a   : > { %612 = vmatprep.subr.bf16.mxu0 %v3395_v16 }
  0x4b   : > { %2659 = vmatpush3.bf16.msra.mxu1 %v3445_v26 }
  0x4c   : > { %2660 = vmatprep.subr.bf16.mxu1 %v3248_v3  ;;  %2297 = vperm.xlu0 %2899, %v2294_v54  }
  0x4d   : > { %613 = vmatpush1.bf16.msra.mxu0 %v3403_v18  ;;  %1832 = vperm.xlu1 %2900, %v1827_v0  }
  0x4e   : > { %614 = vmatprep.subr.bf16.mxu0 %v3426_v22 }
  0x4f   : > { %2661 = vmatpush3.bf16.msra.mxu1 %v3480_v33 }
  0x50   : > { %2662 = vmatprep.subr.bf16.mxu1 %v3248_v3 }
  0x51   : > { %615 = vmatpush1.bf16.msra.mxu0 %v3439_v25  ;;  %1988 = vperm.xlu1 %2900, %v1983_v17   ;;  %v314_v17 = vunpack.c.l.bf16 %v309_v61 }
  0x52   : > { %616 = vmatprep.subr.bf16.mxu0 %v3452_v28 }
  0x53   : > { %2663 = vmatpush3.bf16.msra.mxu1 %v3497_v37 }
  0x54   : > { %2664 = vmatprep.subr.bf16.mxu1 %v3248_v3 }
  0x55   : > { %617 = vmatpush1.bf16.msra.mxu0 %v3462_v30  ;;  %2144 = vperm.xlu1 %2900, %v2139_v20  }
  0x56   : > { %758 = vmatprep.subr.bf16.mxu0 %v3312_v1 }
  0x57   : > { %2665 = vmatpush3.bf16.msra.mxu1 %v3511_v40 }
  0x58   : > { %2670 = vmatprep.subr.bf16.mxu1 %v3248_v3 }
  0x59   : > { %2300 = vperm.xlu1 %2900, %v2295_v23  }
 0x10b   : > { %v481_v35 = vpop.f32.mrb[0].mxu0 }
 0x10c   : > { %v531_v38 = vadd.f32 %v481_v35, %v312_v29  ;;  %v483_v39 = vpop.f32.mrb[1].mxu0 }
 0x10d   : > { %v485_v41 = vpop.f32.mrb[2].mxu0  ;;  %v545_v46 = vadd.f32 %v483_v39, %v313_v36  ;;  %v524_v49 = vpop.f32.mrb[0].mxu1 }
 0x10e   : > { %v2426_v43 = vmul.f32 -1.442695, %v531_v38  ;;  %v532_v44 = vadd.f32 %v485_v41, %v315_v34  ;;  %v487_v45 = vpop.f32.mrb[3].mxu0  ;;  %v2648_v50 = vpop.f32.mrb[1].mxu1  ;;  %v559_v63 = vadd.f32 %v3622_v59, %v524_v49 }
 0x10f   : > { %v546_v47 = vadd.f32 %v487_v45, %v316_v42  ;;  %v2428_v48 = vmul.f32 -1.442695, %v545_v46  ;;  %v527_v52 = vpop.f32.mrb[2].mxu1  ;;  %v582_v41 = vpop.permute.xlu0 %581 }
 0x110   : > { %2933 = vpow2.f32 %v2426_v43  ;;  %v2427_v21 = vmul.f32 -1.442695, %v532_v44  ;;  %v2649_v53 = vpop.f32.mrb[3].mxu1  ;;  %v560_v27 = vadd.f32 %v3622_v59, %v527_v52  ;;  %vm586_vm10 = vcmp.eq.s32.totalorder %v582_v41, 1 }
 0x111   : > { %v2429_v51 = vmul.f32 -1.442695, %v546_v47 }
 0x112   : > { %2935 = vpow2.f32 %v2427_v21 }
 0x113   : > { %2937 = vpow2.f32 %v2428_v48  ;;  %v585_v50 = vpop.permute.xlu0 %584 }
 0x114   : > { %2939 = vpow2.f32 %v2429_v51  ;;  %vm587_vm11 = vcmp.eq.s32.totalorder %v585_v50, 1 }
 0x11a   : > { %v2934_v54 = vpop.eup %2933 }
 0x11b   : > { %v539_v55 = vadd.f32 1.0, %v2934_v54 }
 0x11c   : > { %v2936_v56 = vpop.eup %2935 }
 0x11d   : > { %2941 = vrcp.f32 %v539_v55  ;;  %v540_v57 = vadd.f32 1.0, %v2936_v56  ;;  %v2938_v58 = vpop.eup %2937 }
 0x11e   : > { %v2940_v60 = vpop.eup %2939  ;;  %v553_v62 = vadd.f32 1.0, %v2938_v58 }
 0x11f   : > { %2943 = vrcp.f32 %v540_v57  ;;  %v554_v0 = vadd.f32 1.0, %v2940_v60 }
 0x120   : > { %2945 = vrcp.f32 %v553_v62 }
 0x121   : > { %2947 = vrcp.f32 %v554_v0 }
 0x127   : > { %v2942_v20 = vpop.eup %2941 }
 0x128   : > { %v561_v23 = vmul.f32 %v2942_v20, %v559_v63 }
 0x129   : > { %v2944_v29 = vpop.eup %2943 }
 0x12a   : > { %v563_v34 = vadd.f32 %v561_v23, %v314_v17  ;;  %v562_v35 = vmul.f32 %v2944_v29, %v560_v27  ;;  %v2946_v38 = vpop.eup %2945 }
 0x12b   : > { %v2948_v39 = vpop.eup %2947  ;;  %v567_v42 = vsub.f32 1.0, %v2946_v38  ;;  %v571_v44 = vmul.f32 %v2946_v38, %v3469_v31 }
 0x12c   : > { %2949 = vtanh.f32 %v563_v34  ;;  %v564_v36 = vadd.f32 %v562_v35, %v317_v24  ;;  %v568_v45 = vsub.f32 1.0, %v2948_v39  ;;  %v572_v47 = vmul.f32 %v2948_v39, %v3474_v32 }
 0x12e   : > { %2951 = vtanh.f32 %v564_v36 }
 0x136   : > { %v2950_v43 = vpop.eup %2949 }
 0x137   : > { %v569_v46 = vmul.f32 %v2950_v43, %v567_v42 }
 0x138   : > { %v2952_v21 = vpop.eup %2951 }
 0x139   : > { %v570_v48 = vmul.f32 %v2952_v21, %v568_v45  ;;  %v573_v49 = vadd.f32 %v571_v44, %v569_v46  ;;  %v2431_v21 = vld [vmem:[%s3301_s24 + $0x20] ss:$12 sps:$4 sm:$0xff]  }
 0x13b   : > { %v574_v51 = vadd.f32 %v572_v47, %v570_v48  ;;  %v3630_v52 = vsel %vm586_vm10, %v573_v49, %v3469_v31  ;;  %v2430_v31 = vld [vmem:[%s3301_s24 + $0x18] sm:$0xff]  ;;  %v597_v48 = vunpack.c.l.bf16 %v2431_v21 }
 0x13c   : > { %v595_v55 = vunpack.c.l.bf16 %v2430_v31  ;;  %v596_v60 = vunpack.c.h.bf16 %v2430_v31  ;;  %v600_v31 = vunpack.c.h.bf16 %v2431_v21 }
 0x13d   : > { %v3633_v53 = vsel %vm587_vm11, %v574_v51, %v3474_v32  ;;  %v2432_v32 = vld [vmem:[%s3301_s24 + $0x24] sm:$0xff] }
 0x13e   : > { %v601_v54 = vpack.c.bf16 %v3633_v53, %v3630_v52  ;;  %v598_v56 = vunpack.c.l.bf16 %v2432_v32  ;;  %v599_v20 = vunpack.c.h.bf16 %v2432_v32 }
 0x140   : > { %635 = vmatmul.mubr.bf16.vlgmr.msra.gmra.mrb[4].mxu0 %v601_v54  ;;  %2667 = vmatmul.mubr.bf16.vlgmr.msra.gmra.mrb[4].mxu1 %v601_v54 }
 0x141   : > { %759 = vmatpush1.bf16.msra.mxu0 %v3317_v2  ;;  %2671 = vmatpush3.bf16.msra.mxu1 %v3358_v10 }
 0x142   : > { %760 = vmatprep.subr.bf16.mxu0 %v3325_v5  ;;  %2672 = vmatprep.subr.bf16.mxu1 %v3248_v3 }
 0x143   : > { %790 = vmatprep.mubr.bf16.mxu0 %v3249_v4  ;;  %2686 = vmatprep.mubr.msk.bf16.mxu1 %vm3250_vm0, %v3248_v3 }
 0x145   : > { %761 = vmatpush1.bf16.msra.mxu0 %v3333_v6  ;;  %2673 = vmatpush3.bf16.msra.mxu1 %v3377_v13 }
 0x146   : > { %762 = vmatprep.subr.bf16.mxu0 %v3340_v7  ;;  %2674 = vmatprep.subr.bf16.mxu1 %v3248_v3 }
 0x149   : > { %763 = vmatpush1.bf16.msra.mxu0 %v3347_v8  ;;  %2675 = vmatpush3.bf16.msra.mxu1 %v3389_v15 }
 0x14a   : > { %764 = vmatprep.subr.bf16.mxu0 %v3353_v9  ;;  %2676 = vmatprep.subr.bf16.mxu1 %v3248_v3 }
 0x14d   : > { %765 = vmatpush1.bf16.msra.mxu0 %v3364_v11  ;;  %2677 = vmatpush3.bf16.msra.mxu1 %v3410_v19 }
 0x14e   : > { %766 = vmatprep.subr.bf16.mxu0 %v3371_v12  ;;  %2678 = vmatprep.subr.bf16.mxu1 %v3248_v3 }
 0x151   : > { %767 = vmatpush1.bf16.msra.mxu0 %v3382_v14  ;;  %2679 = vmatpush3.bf16.msra.mxu1 %v3445_v26 }
 0x152   : > { %768 = vmatprep.subr.bf16.mxu0 %v3395_v16  ;;  %2680 = vmatprep.subr.bf16.mxu1 %v3248_v3 }
 0x155   : > { %769 = vmatpush1.bf16.msra.mxu0 %v3403_v18  ;;  %2681 = vmatpush3.bf16.msra.mxu1 %v3480_v33 }
 0x156   : > { %770 = vmatprep.subr.bf16.mxu0 %v3426_v22  ;;  %2682 = vmatprep.subr.bf16.mxu1 %v3248_v3 }
 0x159   : > { %771 = vmatpush1.bf16.msra.mxu0 %v3439_v25  ;;  %2683 = vmatpush3.bf16.msra.mxu1 %v3497_v37 }
 0x15a   : > { %772 = vmatprep.subr.bf16.mxu0 %v3452_v28  ;;  %2684 = vmatprep.subr.bf16.mxu1 %v3248_v3 }
 0x15d   : > { %773 = vmatpush1.bf16.msra.mxu0 %v3462_v30  ;;  %2685 = vmatpush3.bf16.msra.mxu1 %v3511_v40 }
 0x15e   : > { %914 = vmatprep.subr.bf16.mxu0 %v3312_v1  ;;  %2690 = vmatprep.subr.bf16.mxu1 %v3248_v3 }
 0x213   : > { %v636_v57 = vpop.f32.mrb[4].mxu0  ;;  %v679_v58 = vpop.f32.mrb[4].mxu1 }
 0x214   : > { %v686_v61 = vadd.f32 %v636_v57, %v595_v55  ;;  %v638_v62 = vpop.f32.mrb[5].mxu0  ;;  %v2668_v63 = vpop.f32.mrb[5].mxu1  ;;  %v714_v49 = vadd.f32 %v3622_v59, %v679_v58 }
 0x215   : > { %v640_v0 = vpop.f32.mrb[6].mxu0  ;;  %v682_v17 = vpop.f32.mrb[6].mxu1  ;;  %v700_v34 = vadd.f32 %v638_v62, %v596_v60 }
 0x216   : > { %v2434_v23 = vmul.f32 -1.442695, %v686_v61  ;;  %v687_v24 = vadd.f32 %v640_v0, %v598_v56  ;;  %v642_v27 = vpop.f32.mrb[7].mxu0  ;;  %v2669_v29 = vpop.f32.mrb[7].mxu1  ;;  %v715_v32 = vadd.f32 %v3622_v59, %v682_v17 }
 0x217   : > { %v701_v36 = vadd.f32 %v642_v27, %v599_v20  ;;  %v2436_v38 = vmul.f32 -1.442695, %v700_v34  ;;  %v738_v63 = vpop.permute.xlu1 %737 }
 0x218   : > { %2953 = vpow2.f32 %v2434_v23  ;;  %v2435_v35 = vmul.f32 -1.442695, %v687_v24  ;;  %vm742_vm12 = vcmp.eq.s32.totalorder %v738_v63, 1 }
 0x219   : > { %v2437_v39 = vmul.f32 -1.442695, %v701_v36 }
 0x21a   : > { %2955 = vpow2.f32 %v2435_v35 }
 0x21b   : > { %2957 = vpow2.f32 %v2436_v38  ;;  %v741_v35 = vpop.permute.xlu1 %740 }
 0x21c   : > { %2959 = vpow2.f32 %v2437_v39  ;;  %vm743_vm13 = vcmp.eq.s32.totalorder %v741_v35, 1 }
 0x222   : > { %v2954_v41 = vpop.eup %2953 }
 0x223   : > { %v694_v42 = vadd.f32 1.0, %v2954_v41 }
 0x224   : > { %v2956_v43 = vpop.eup %2955 }
 0x225   : > { %2961 = vrcp.f32 %v694_v42  ;;  %v695_v44 = vadd.f32 1.0, %v2956_v43  ;;  %v2958_v45 = vpop.eup %2957 }
 0x226   : > { %v2960_v46 = vpop.eup %2959  ;;  %v708_v47 = vadd.f32 1.0, %v2958_v45 }
 0x227   : > { %2963 = vrcp.f32 %v695_v44  ;;  %v709_v50 = vadd.f32 1.0, %v2960_v46 }
 0x228   : > { %2965 = vrcp.f32 %v708_v47 }
 0x229   : > { %2967 = vrcp.f32 %v709_v50 }
 0x22f   : > { %v2962_v51 = vpop.eup %2961 }
 0x230   : > { %v716_v54 = vmul.f32 %v2962_v51, %v714_v49 }
 0x231   : > { %v2964_v55 = vpop.eup %2963 }
 0x232   : > { %v718_v56 = vadd.f32 %v716_v54, %v597_v48  ;;  %v717_v57 = vmul.f32 %v2964_v55, %v715_v32  ;;  %v2966_v61 = vpop.eup %2965 }
 0x233   : > { %v2968_v62 = vpop.eup %2967  ;;  %v722_v0 = vsub.f32 1.0, %v2966_v61  ;;  %v726_v24 = vmul.f32 %v2966_v61, %v3630_v52 }
 0x234   : > { %2969 = vtanh.f32 %v718_v56  ;;  %v719_v60 = vadd.f32 %v717_v57, %v600_v31  ;;  %v723_v58 = vsub.f32 1.0, %v2968_v62  ;;  %v727_v17 = vmul.f32 %v2968_v62, %v3633_v53 }
 0x236   : > { %2971 = vtanh.f32 %v719_v60 }
 0x23e   : > { %v2970_v20 = vpop.eup %2969 }
 0x23f   : > { %v724_v23 = vmul.f32 %v2970_v20, %v722_v0 }
 0x240   : > { %v2972_v27 = vpop.eup %2971 }
 0x241   : > { %v725_v29 = vmul.f32 %v2972_v27, %v723_v58  ;;  %v728_v34 = vadd.f32 %v726_v24, %v724_v23  ;;  %v2439_v23 = vld [vmem:[%s3301_s24 + $0x38] ss:$12 sps:$4 sm:$0xff]  }
 0x242   : > { %v753_v27 = vunpack.c.l.bf16 %v2439_v23 }
 0x243   : > { %v729_v36 = vadd.f32 %v727_v17, %v725_v29  ;;  %v3680_v38 = vsel %vm742_vm12, %v728_v34, %v3630_v52  ;;  %v2440_v52 = vld [vmem:[%s3301_s24 + $0x3c] sm:$0xff] }
 0x244   : > { %v754_v42 = vunpack.c.l.bf16 %v2440_v52  ;;  %v755_v50 = vunpack.c.h.bf16 %v2440_v52 }
 0x245   : > { %v3683_v39 = vsel %vm743_vm13, %v729_v36, %v3633_v53  ;;  %v756_v36 = vunpack.c.h.bf16 %v2439_v23 }
 0x246   : > { %v757_v41 = vpack.c.bf16 %v3683_v39, %v3680_v38 }
 0x248   : > { %791 = vmatmul.mubr.bf16.vlgmr.msra.gmra.mrb[8].mxu0 %v757_v41  ;;  %2687 = vmatmul.mubr.bf16.vlgmr.msra.gmra.mrb[8].mxu1 %v757_v41 }
 0x249   : > { %915 = vmatpush1.bf16.msra.mxu0 %v3317_v2  ;;  %2691 = vmatpush3.bf16.msra.mxu1 %v3358_v10  ;;  %v2438_v2 = vld [vmem:[%s3301_s24 + $0x30] sm:$0xff] }
 0x24a   : > { %916 = vmatprep.subr.bf16.mxu0 %v3325_v5  ;;  %2692 = vmatprep.subr.bf16.mxu1 %v3248_v3  ;;  %v751_v53 = vunpack.c.l.bf16 %v2438_v2  ;;  %v752_v45 = vunpack.c.h.bf16 %v2438_v2 }
 0x24b   : > { %946 = vmatprep.mubr.bf16.mxu0 %v3249_v4  ;;  %2706 = vmatprep.mubr.msk.bf16.mxu1 %vm3250_vm0, %v3248_v3 }
 0x24d   : > { %917 = vmatpush1.bf16.msra.mxu0 %v3333_v6  ;;  %2693 = vmatpush3.bf16.msra.mxu1 %v3377_v13 }
 0x24e   : > { %918 = vmatprep.subr.bf16.mxu0 %v3340_v7  ;;  %2694 = vmatprep.subr.bf16.mxu1 %v3248_v3 }
 0x251   : > { %919 = vmatpush1.bf16.msra.mxu0 %v3347_v8  ;;  %2695 = vmatpush3.bf16.msra.mxu1 %v3389_v15 }
 0x252   : > { %920 = vmatprep.subr.bf16.mxu0 %v3353_v9  ;;  %2696 = vmatprep.subr.bf16.mxu1 %v3248_v3 }
 0x255   : > { %921 = vmatpush1.bf16.msra.mxu0 %v3364_v11  ;;  %2697 = vmatpush3.bf16.msra.mxu1 %v3410_v19 }
 0x256   : > { %922 = vmatprep.subr.bf16.mxu0 %v3371_v12  ;;  %2698 = vmatprep.subr.bf16.mxu1 %v3248_v3 }
 0x259   : > { %923 = vmatpush1.bf16.msra.mxu0 %v3382_v14  ;;  %2699 = vmatpush3.bf16.msra.mxu1 %v3445_v26 }
 0x25a   : > { %924 = vmatprep.subr.bf16.mxu0 %v3395_v16  ;;  %2700 = vmatprep.subr.bf16.mxu1 %v3248_v3 }
 0x25d   : > { %925 = vmatpush1.bf16.msra.mxu0 %v3403_v18  ;;  %2701 = vmatpush3.bf16.msra.mxu1 %v3480_v33 }
 0x25e   : > { %926 = vmatprep.subr.bf16.mxu0 %v3426_v22  ;;  %2702 = vmatprep.subr.bf16.mxu1 %v3248_v3 }
 0x261   : > { %927 = vmatpush1.bf16.msra.mxu0 %v3439_v25  ;;  %2703 = vmatpush3.bf16.msra.mxu1 %v3497_v37 }
 0x262   : > { %928 = vmatprep.subr.bf16.mxu0 %v3452_v28  ;;  %2704 = vmatprep.subr.bf16.mxu1 %v3248_v3 }
 0x265   : > { %929 = vmatpush1.bf16.msra.mxu0 %v3462_v30  ;;  %2705 = vmatpush3.bf16.msra.mxu1 %v3511_v40 }
 0x266   : > { %1070 = vmatprep.subr.bf16.mxu0 %v3312_v1  ;;  %2710 = vmatprep.subr.bf16.mxu1 %v3248_v3 }
 0x31b   : > { %v792_v43 = vpop.f32.mrb[8].mxu0  ;;  %v835_v44 = vpop.f32.mrb[8].mxu1 }
 0x31c   : > { %v842_v46 = vadd.f32 %v792_v43, %v751_v53  ;;  %v794_v21 = vpop.f32.mrb[9].mxu0  ;;  %v2688_v47 = vpop.f32.mrb[9].mxu1  ;;  %v870_v29 = vadd.f32 %v3622_v59, %v835_v44 }
 0x31d   : > { %v796_v48 = vpop.f32.mrb[10].mxu0  ;;  %v838_v49 = vpop.f32.mrb[10].mxu1  ;;  %v856_v1 = vadd.f32 %v794_v21, %v752_v45 }
 0x31e   : > { %v2442_v51 = vmul.f32 -1.442695, %v842_v46  ;;  %v843_v54 = vadd.f32 %v796_v48, %v754_v42  ;;  %v798_v31 = vpop.f32.mrb[11].mxu0  ;;  %v2689_v32 = vpop.f32.mrb[11].mxu1  ;;  %v871_v41 = vadd.f32 %v3622_v59, %v838_v49 }
 0x31f   : > { %v857_v56 = vadd.f32 %v798_v31, %v755_v50  ;;  %v2444_v57 = vmul.f32 -1.442695, %v856_v1  ;;  %v894_v31 = vpop.permute.xlu0 %893  ;;  %v897_v32 = vpop.permute.xlu1 %896 }
 0x320   : > { %2973 = vpow2.f32 %v2442_v51  ;;  %v2443_v55 = vmul.f32 -1.442695, %v843_v54  ;;  %vm898_vm14 = vcmp.eq.s32.totalorder %v894_v31, 1  ;;  %vm899_vm15 = vcmp.eq.s32.totalorder %v897_v32, 1 }
 0x321   : > { %v2445_v60 = vmul.f32 -1.442695, %v857_v56 }
 0x322   : > { %2975 = vpow2.f32 %v2443_v55 }
 0x323   : > { %2977 = vpow2.f32 %v2444_v57  ;;  %v1053_v31 = vpop.permute.xlu1 %1052 }
 0x324   : > { %2979 = vpow2.f32 %v2445_v60  ;;  %v3740_v60 = vld [vmem:[%s4410_s1] ss:$12 sps:$4 sm:$0xff]   ;;  %vm1055_vm2 = vcmp.eq.s32.totalorder %v1053_v31, 1 }
 0x32a   : > { %v2974_v61 = vpop.eup %2973 }
 0x32b   : > { %v850_v62 = vadd.f32 1.0, %v2974_v61 }
 0x32c   : > { %v2976_v63 = vpop.eup %2975 }
 0x32d   : > { %2981 = vrcp.f32 %v850_v62  ;;  %v851_v0 = vadd.f32 1.0, %v2976_v63  ;;  %v2978_v20 = vpop.eup %2977 }
 0x32e   : > { %v2980_v58 = vpop.eup %2979  ;;  %v864_v24 = vadd.f32 1.0, %v2978_v20 }
 0x32f   : > { %2983 = vrcp.f32 %v851_v0  ;;  %v865_v17 = vadd.f32 1.0, %v2980_v58  ;;  %v2447_v58 = vld [vmem:[%s3301_s24 + $0x50] ss:$12 sps:$4 sm:$0xff]  }
 0x330   : > { %2985 = vrcp.f32 %v864_v24  ;;  %v909_v24 = vunpack.c.l.bf16 %v2447_v58 }
 0x331   : > { %2987 = vrcp.f32 %v865_v17 }
 0x337   : > { %v2982_v34 = vpop.eup %2981 }
 0x338   : > { %v872_v35 = vmul.f32 %v2982_v34, %v870_v29 }
 0x339   : > { %v2984_v2 = vpop.eup %2983 }
 0x33a   : > { %v874_v52 = vadd.f32 %v872_v35, %v753_v27  ;;  %v873_v53 = vmul.f32 %v2984_v2, %v871_v41  ;;  %v2986_v43 = vpop.eup %2985  ;;  %v912_v35 = vunpack.c.h.bf16 %v2447_v58 }
 0x33b   : > { %v2988_v45 = vpop.eup %2987  ;;  %v878_v46 = vsub.f32 1.0, %v2986_v43  ;;  %v882_v44 = vmul.f32 %v2986_v43, %v3680_v38 }
 0x33c   : > { %2989 = vtanh.f32 %v874_v52  ;;  %v875_v42 = vadd.f32 %v873_v53, %v756_v36  ;;  %v879_v47 = vsub.f32 1.0, %v2988_v45  ;;  %v883_v51 = vmul.f32 %v2988_v45, %v3683_v39 }
 0x33e   : > { %2991 = vtanh.f32 %v875_v42 }
 0x346   : > { %v2990_v21 = vpop.eup %2989 }
 0x347   : > { %v880_v48 = vmul.f32 %v2990_v21, %v878_v46 }
 0x348   : > { %v2992_v50 = vpop.eup %2991 }
 0x349   : > { %v881_v54 = vmul.f32 %v2992_v50, %v879_v47  ;;  %v884_v49 = vadd.f32 %v882_v44, %v880_v48 }
 0x34b   : > { %v885_v1 = vadd.f32 %v883_v51, %v881_v54  ;;  %v3730_v55 = vsel %vm898_vm14, %v884_v49, %v3680_v38  ;;  %v1050_v49 = vpop.permute.xlu0 %1049 }
 0x34c   : > { %vm1054_vm1 = vcmp.eq.s32.totalorder %v1050_v49, 1 }
 0x34d   : > { %v3733_v56 = vsel %vm899_vm15, %v885_v1, %v3683_v39 }
 0x34e   : > { %v913_v57 = vpack.c.bf16 %v3733_v56, %v3730_v55 }
 0x350   : > { %947 = vmatmul.mubr.bf16.vlgmr.msra.gmra.mrb[12].mxu0 %v913_v57  ;;  %2707 = vmatmul.mubr.bf16.vlgmr.msra.gmra.mrb[12].mxu1 %v913_v57 }
 0x351   : > { %1071 = vmatpush1.bf16.msra.mxu0 %v3740_v60  ;;  %2711 = vmatpush3.bf16.msra.mxu1 %v3358_v10 }
 0x352   : > { %1072 = vmatprep.subr.bf16.mxu0 %v3325_v5  ;;  %2712 = vmatprep.subr.bf16.mxu1 %v3248_v3  ;;  %v3778_v5 = vld [vmem:[%s4410_s1 + $0x4] ss:$12 sps:$4 sm:$0xff]  }
 0x353   : > { %1102 = vmatprep.mubr.bf16.mxu0 %v3249_v4  ;;  %2726 = vmatprep.mubr.msk.bf16.mxu1 %vm3250_vm0, %v3248_v3 }
 0x355   : > { %1073 = vmatpush1.bf16.msra.mxu0 %v3333_v6  ;;  %2713 = vmatpush3.bf16.msra.mxu1 %v3377_v13  ;;  %v2446_v6 = vld [vmem:[%s3301_s24 + $0x48] sm:$0xff] }
 0x356   : > { %1074 = vmatprep.subr.bf16.mxu0 %v3340_v7  ;;  %2714 = vmatprep.subr.bf16.mxu1 %v3248_v3  ;;  %v2448_v7 = vld [vmem:[%s3301_s24 + $0x54] sm:$0xff] }
 0x359   : > { %1075 = vmatpush1.bf16.msra.mxu0 %v3347_v8  ;;  %2715 = vmatpush3.bf16.msra.mxu1 %v3389_v15  ;;  %v907_v8 = vunpack.c.l.bf16 %v2446_v6 }
 0x35a   : > { %1076 = vmatprep.subr.bf16.mxu0 %v3353_v9  ;;  %2716 = vmatprep.subr.bf16.mxu1 %v3248_v3  ;;  %v910_v9 = vunpack.c.l.bf16 %v2448_v7 }
 0x35d   : > { %1077 = vmatpush1.bf16.msra.mxu0 %v3364_v11  ;;  %2717 = vmatpush3.bf16.msra.mxu1 %v3410_v19  ;;  %v911_v19 = vunpack.c.h.bf16 %v2448_v7  ;;  %v3801_v7 = vld [vmem:[%s4410_s1 + $0x8] ss:$12 sps:$4 sm:$0xff]  }
 0x35e   : > { %1078 = vmatprep.subr.bf16.mxu0 %v3371_v12  ;;  %2718 = vmatprep.subr.bf16.mxu1 %v3248_v3  ;;  %v908_v12 = vunpack.c.h.bf16 %v2446_v6 }
 0x361   : > { %1079 = vmatpush1.bf16.msra.mxu0 %v3382_v14  ;;  %2719 = vmatpush3.bf16.msra.mxu1 %v3445_v26 }
 0x362   : > { %1080 = vmatprep.subr.bf16.mxu0 %v3395_v16  ;;  %2720 = vmatprep.subr.bf16.mxu1 %v3248_v3 }
 0x365   : > { %1081 = vmatpush1.bf16.msra.mxu0 %v3403_v18  ;;  %2721 = vmatpush3.bf16.msra.mxu1 %v3480_v33 }
 0x366   : > { %1082 = vmatprep.subr.bf16.mxu0 %v3426_v22  ;;  %2722 = vmatprep.subr.bf16.mxu1 %v3248_v3 }
 0x369   : > { %1083 = vmatpush1.bf16.msra.mxu0 %v3439_v25  ;;  %2723 = vmatpush3.bf16.msra.mxu1 %v3497_v37 }
 0x36a   : > { %1084 = vmatprep.subr.bf16.mxu0 %v3452_v28  ;;  %2724 = vmatprep.subr.bf16.mxu1 %v3248_v3 }
 0x36d   : > { %1085 = vmatpush1.bf16.msra.mxu0 %v3462_v30  ;;  %2725 = vmatpush3.bf16.msra.mxu1 %v3511_v40 }
 0x36e   : > { %1226 = vmatprep.subr.bf16.mxu0 %v3778_v5  ;;  %2730 = vmatprep.subr.bf16.mxu1 %v3248_v3 }
 0x423   : > { %v948_v10 = vpop.f32.mrb[12].mxu0  ;;  %v991_v11 = vpop.f32.mrb[12].mxu1 }
 0x424   : > { %v998_v13 = vadd.f32 %v948_v10, %v907_v8  ;;  %v950_v14 = vpop.f32.mrb[13].mxu0  ;;  %v2708_v15 = vpop.f32.mrb[13].mxu1  ;;  %v1026_v27 = vadd.f32 %v3622_v59, %v991_v11  ;;  %v3823_v8 = vld [vmem:[%s4410_s1 + $0x20] ss:$12 sps:$4 sm:$0xff]   ;;  %v3836_v10 = vld [vmem:[%s4410_s1 + $0x30] ss:$12 sps:$4 sm:$0xff]  }
 0x425   : > { %v952_v16 = vpop.f32.mrb[14].mxu0  ;;  %v994_v18 = vpop.f32.mrb[14].mxu1  ;;  %v1012_v30 = vadd.f32 %v950_v14, %v908_v12  ;;  %v3842_v11 = vld [vmem:[%s4410_s1 + $0x38] ss:$12 sps:$4 sm:$0xff]   ;;  %v3861_v14 = vld [vmem:[%s4410_s1 + $0x50] ss:$12 sps:$4 sm:$0xff]  }
 0x426   : > { %v2450_v22 = vmul.f32 -1.442695, %v998_v13  ;;  %v999_v25 = vadd.f32 %v952_v16, %v910_v9  ;;  %v954_v26 = vpop.f32.mrb[15].mxu0  ;;  %v2709_v28 = vpop.f32.mrb[15].mxu1  ;;  %v1027_v36 = vadd.f32 %v3622_v59, %v994_v18  ;;  %v3829_v9 = vld [vmem:[%s4410_s1 + $0x34] ss:$12 sps:$4 sm:$0xff]  }
 0x427   : > { %v1013_v37 = vadd.f32 %v954_v26, %v911_v19  ;;  %v2452_v40 = vmul.f32 -1.442695, %v1012_v30  ;;  %v3848_v12 = vld [vmem:[%s4410_s1 + $0x4c] ss:$12 sps:$4 sm:$0xff]   ;;  %v3855_v13 = vld [vmem:[%s4410_s1 + $0x48] ss:$12 sps:$4 sm:$0xff]  }
 0x428   : > { %2993 = vpow2.f32 %v2450_v22  ;;  %v2451_v33 = vmul.f32 -1.442695, %v999_v25  ;;  %v3867_v15 = vld [vmem:[%s4410_s1 + $0x64] ss:$12 sps:$4 sm:$0xff]   ;;  %v3874_v16 = vld [vmem:[%s4410_s1 + $0x60] ss:$12 sps:$4 sm:$0xff]  }
 0x429   : > { %v2453_v38 = vmul.f32 -1.442695, %v1013_v37  ;;  %v3880_v18 = vld [vmem:[%s4410_s1 + $0x68] ss:$12 sps:$4 sm:$0xff]   ;;  %v3893_v22 = vld [vmem:[%s4410_s1 + $0x78] ss:$12 sps:$4 sm:$0xff]  }
 0x42a   : > { %2995 = vpow2.f32 %v2451_v33  ;;  %v3886_v19 = vld [vmem:[%s4410_s1 + $0x7c] ss:$12 sps:$4 sm:$0xff]   ;;  %v3899_v25 = vld [vmem:[%s4410_s1 + $0x80] ss:$12 sps:$4 sm:$0xff]   ;;  %v3918_v30 = vld [vmem:[%s4410_s1 + $0x98] ss:$12 sps:$4 sm:$0xff]  }
 0x42b   : > { %2997 = vpow2.f32 %v2452_v40  ;;  %v3905_v26 = vld [vmem:[%s4410_s1 + $0x94] ss:$12 sps:$4 sm:$0xff]   ;;  %v3912_v28 = vld [vmem:[%s4410_s1 + $0x90] ss:$12 sps:$4 sm:$0xff]   ;;  %v3924_v33 = vld [vmem:[%s4410_s1 + $0xac] ss:$12 sps:$4 sm:$0xff]  }
 0x42c   : > { %2999 = vpow2.f32 %v2453_v38  ;;  %v3931_v37 = vld [vmem:[%s4410_s1 + $0xa8] ss:$12 sps:$4 sm:$0xff]   ;;  %v3937_v40 = vld [vmem:[%s4410_s1 + $0xb0] ss:$12 sps:$4 sm:$0xff]   ;;  %v2454_v38 = vld [vmem:[%s3301_s24 + $0x60] sm:$0xff] }
 0x432   : > { %v2994_v39 = vpop.eup %2993 }
 0x433   : > { %v1006_v61 = vadd.f32 1.0, %v2994_v39  ;;  %v2456_v39 = vld [vmem:[%s3301_s24 + $0x6c] sm:$0xff] }
 0x434   : > { %v2996_v62 = vpop.eup %2995 }
 0x435   : > { %3001 = vrcp.f32 %v1006_v61  ;;  %v1007_v63 = vadd.f32 1.0, %v2996_v62  ;;  %v2998_v0 = vpop.eup %2997  ;;  %v1063_v61 = vunpack.c.l.bf16 %v2454_v38  ;;  %v1066_v62 = vunpack.c.l.bf16 %v2456_v39 }
 0x436   : > { %v3000_v20 = vpop.eup %2999  ;;  %v1020_v23 = vadd.f32 1.0, %v2998_v0 }
 0x437   : > { %3003 = vrcp.f32 %v1007_v63  ;;  %v1021_v29 = vadd.f32 1.0, %v3000_v20  ;;  %v1064_v20 = vunpack.c.h.bf16 %v2454_v38 }
 0x438   : > { %3005 = vrcp.f32 %v1020_v23 }
 0x439   : > { %3007 = vrcp.f32 %v1021_v29 }
 0x43f   : > { %v3002_v17 = vpop.eup %3001 }
 0x440   : > { %v1028_v34 = vmul.f32 %v3002_v17, %v1026_v27  ;;  %v1067_v17 = vunpack.c.h.bf16 %v2456_v39 }
 0x441   : > { %v3004_v41 = vpop.eup %3003 }
 0x442   : > { %v1030_v2 = vadd.f32 %v1028_v34, %v909_v24  ;;  %v1029_v52 = vmul.f32 %v3004_v41, %v1027_v36  ;;  %v3006_v42 = vpop.eup %3005 }
 0x443   : > { %v3008_v43 = vpop.eup %3007  ;;  %v1034_v45 = vsub.f32 1.0, %v3006_v42  ;;  %v1038_v21 = vmul.f32 %v3006_v42, %v3730_v55 }
 0x444   : > { %3009 = vtanh.f32 %v1030_v2  ;;  %v1031_v53 = vadd.f32 %v1029_v52, %v912_v35  ;;  %v1035_v44 = vsub.f32 1.0, %v3008_v43  ;;  %v1039_v50 = vmul.f32 %v3008_v43, %v3733_v56 }
 0x446   : > { %3011 = vtanh.f32 %v1031_v53 }
 0x44e   : > { %v3010_v46 = vpop.eup %3009 }
 0x44f   : > { %v1036_v47 = vmul.f32 %v3010_v46, %v1034_v45 }
 0x450   : > { %v3012_v48 = vpop.eup %3011 }
 0x451   : > { %v1037_v51 = vmul.f32 %v3012_v48, %v1035_v44  ;;  %v1040_v54 = vadd.f32 %v1038_v21, %v1036_v47 }
 0x453   : > { %v1041_v32 = vadd.f32 %v1039_v50, %v1037_v51  ;;  %v3790_v1 = vsel %vm1054_vm1, %v1040_v54, %v3730_v55  ;;  %v3807_v55 = vld [vmem:[%s4410_s1 + $0x1c] ss:$12 sps:$4 sm:$0xff]  }
 0x454   : > { %v2455_v50 = vld [vmem:[%s3301_s24 + $0x68] ss:$12 sps:$4 sm:$0xff]  }
 0x455   : > { %v3793_v57 = vsel %vm1055_vm2, %v1041_v32, %v3733_v56  ;;  %v3817_v56 = vld [vmem:[%s4410_s1 + $0x18] ss:$12 sps:$4 sm:$0xff]   ;;  %v1065_v54 = vunpack.c.l.bf16 %v2455_v50  ;;  %v1068_v38 = vunpack.c.h.bf16 %v2455_v50 }
 0x456   : > { %v1069_v6 = vpack.c.bf16 %v3793_v57, %v3790_v1 }
 0x458   : > { %1103 = vmatmul.mubr.bf16.vlgmr.msra.gmra.mrb[16].mxu0 %v1069_v6  ;;  %2727 = vmatmul.mubr.bf16.vlgmr.msra.gmra.mrb[16].mxu1 %v1069_v6 }
 0x459   : > { %1227 = vmatpush1.bf16.msra.mxu0 %v3740_v60  ;;  %2731 = vmatpush3.bf16.msra.mxu1 %v3801_v7 }
 0x45a   : > { %1228 = vmatprep.subr.bf16.mxu0 %v3807_v55  ;;  %2732 = vmatprep.subr.bf16.mxu1 %v3248_v3 }
 0x45b   : > { %1258 = vmatprep.mubr.bf16.mxu0 %v3249_v4  ;;  %2746 = vmatprep.mubr.msk.bf16.mxu1 %vm3250_vm0, %v3248_v3 }
 0x45d   : > { %1229 = vmatpush1.bf16.msra.mxu0 %v3817_v56  ;;  %2733 = vmatpush3.bf16.msra.mxu1 %v3823_v8 }
 0x45e   : > { %1230 = vmatprep.subr.bf16.mxu0 %v3829_v9  ;;  %2734 = vmatprep.subr.bf16.mxu1 %v3248_v3 }
 0x461   : > { %1231 = vmatpush1.bf16.msra.mxu0 %v3836_v10  ;;  %2735 = vmatpush3.bf16.msra.mxu1 %v3842_v11 }
 0x462   : > { %1232 = vmatprep.subr.bf16.mxu0 %v3848_v12  ;;  %2736 = vmatprep.subr.bf16.mxu1 %v3248_v3 }
 0x465   : > { %1233 = vmatpush1.bf16.msra.mxu0 %v3855_v13  ;;  %2737 = vmatpush3.bf16.msra.mxu1 %v3861_v14 }
 0x466   : > { %1234 = vmatprep.subr.bf16.mxu0 %v3867_v15  ;;  %2738 = vmatprep.subr.bf16.mxu1 %v3248_v3 }
 0x469   : > { %1235 = vmatpush1.bf16.msra.mxu0 %v3874_v16  ;;  %2739 = vmatpush3.bf16.msra.mxu1 %v3880_v18 }
 0x46a   : > { %1236 = vmatprep.subr.bf16.mxu0 %v3886_v19  ;;  %2740 = vmatprep.subr.bf16.mxu1 %v3248_v3 }
 0x46d   : > { %1237 = vmatpush1.bf16.msra.mxu0 %v3893_v22  ;;  %2741 = vmatpush3.bf16.msra.mxu1 %v3899_v25 }
 0x46e   : > { %1238 = vmatprep.subr.bf16.mxu0 %v3905_v26  ;;  %2742 = vmatprep.subr.bf16.mxu1 %v3248_v3 }
 0x471   : > { %1239 = vmatpush1.bf16.msra.mxu0 %v3912_v28  ;;  %2743 = vmatpush3.bf16.msra.mxu1 %v3918_v30 }
 0x472   : > { %1240 = vmatprep.subr.bf16.mxu0 %v3924_v33  ;;  %2744 = vmatprep.subr.bf16.mxu1 %v3248_v3 }
 0x475   : > { %1241 = vmatpush1.bf16.msra.mxu0 %v3931_v37  ;;  %2745 = vmatpush3.bf16.msra.mxu1 %v3937_v40 }
 0x476   : > { %1382 = vmatprep.subr.bf16.mxu0 %v3778_v5  ;;  %2750 = vmatprep.subr.bf16.mxu1 %v3248_v3 }
 0x52b   : > { %v1104_v63 = vpop.f32.mrb[16].mxu0  ;;  %v1147_v0 = vpop.f32.mrb[16].mxu1 }
 0x52c   : > { %v1154_v58 = vadd.f32 %v1104_v63, %v1063_v61  ;;  %v1106_v23 = vpop.f32.mrb[17].mxu0  ;;  %v2728_v24 = vpop.f32.mrb[17].mxu1  ;;  %v1182_v49 = vadd.f32 %v3622_v59, %v1147_v0 }
 0x52d   : > { %v1108_v27 = vpop.f32.mrb[18].mxu0  ;;  %v1150_v29 = vpop.f32.mrb[18].mxu1  ;;  %v1168_v2 = vadd.f32 %v1106_v23, %v1064_v20 }
 0x52e   : > { %v2458_v34 = vmul.f32 -1.442695, %v1154_v58  ;;  %v1155_v35 = vadd.f32 %v1108_v27, %v1066_v62  ;;  %v1110_v36 = vpop.f32.mrb[19].mxu0  ;;  %v2729_v41 = vpop.f32.mrb[19].mxu1  ;;  %v1183_v39 = vadd.f32 %v3622_v59, %v1150_v29 }
 0x52f   : > { %v1169_v53 = vadd.f32 %v1110_v36, %v1067_v17  ;;  %v2460_v42 = vmul.f32 -1.442695, %v1168_v2  ;;  %v1206_v29 = vpop.permute.xlu0 %1205  ;;  %v1209_v2 = vpop.permute.xlu1 %1208 }
 0x530   : > { %3013 = vpow2.f32 %v2458_v34  ;;  %v2459_v52 = vmul.f32 -1.442695, %v1155_v35  ;;  %vm1210_vm3 = vcmp.eq.s32.totalorder %v1206_v29, 1  ;;  %vm1211_vm4 = vcmp.eq.s32.totalorder %v1209_v2, 1 }
 0x531   : > { %v2461_v43 = vmul.f32 -1.442695, %v1169_v53 }
 0x532   : > { %3015 = vpow2.f32 %v2459_v52 }
 0x533   : > { %3017 = vpow2.f32 %v2460_v42 }
 0x534   : > { %3019 = vpow2.f32 %v2461_v43 }
 0x53a   : > { %v3014_v45 = vpop.eup %3013 }
 0x53b   : > { %v1162_v46 = vadd.f32 1.0, %v3014_v45 }
 0x53c   : > { %v3016_v21 = vpop.eup %3015 }
 0x53d   : > { %3021 = vrcp.f32 %v1162_v46  ;;  %v1163_v44 = vadd.f32 1.0, %v3016_v21  ;;  %v3018_v47 = vpop.eup %3017 }
 0x53e   : > { %v3020_v48 = vpop.eup %3019  ;;  %v1176_v51 = vadd.f32 1.0, %v3018_v47 }
 0x53f   : > { %3023 = vrcp.f32 %v1163_v44  ;;  %v1177_v31 = vadd.f32 1.0, %v3020_v48 }
 0x540   : > { %3025 = vrcp.f32 %v1176_v51 }
 0x541   : > { %3027 = vrcp.f32 %v1177_v31 }
 0x547   : > { %v3022_v32 = vpop.eup %3021 }
 0x548   : > { %v1184_v6 = vmul.f32 %v3022_v32, %v1182_v49 }
 0x549   : > { %v3024_v61 = vpop.eup %3023 }
 0x54a   : > { %v1186_v62 = vadd.f32 %v1184_v6, %v1065_v54  ;;  %v1185_v63 = vmul.f32 %v3024_v61, %v1183_v39  ;;  %v3026_v58 = vpop.eup %3025 }
 0x54b   : > { %v3028_v23 = vpop.eup %3027  ;;  %v1190_v24 = vsub.f32 1.0, %v3026_v58  ;;  %v1194_v0 = vmul.f32 %v3026_v58, %v3790_v1 }
 0x54c   : > { %3029 = vtanh.f32 %v1186_v62  ;;  %v1187_v20 = vadd.f32 %v1185_v63, %v1068_v38  ;;  %v1191_v17 = vsub.f32 1.0, %v3028_v23  ;;  %v1195_v36 = vmul.f32 %v3028_v23, %v3793_v57 }
 0x54e   : > { %3031 = vtanh.f32 %v1187_v20 }
 0x556   : > { %v3030_v27 = vpop.eup %3029 }
 0x557   : > { %v1192_v34 = vmul.f32 %v3030_v27, %v1190_v24 }
 0x558   : > { %v3032_v35 = vpop.eup %3031 }
 0x559   : > { %v1193_v41 = vmul.f32 %v3032_v35, %v1191_v17  ;;  %v1196_v59 = vadd.f32 %v1194_v0, %v1192_v34  ;;  %v2463_v35 = vld [vmem:[%s3301_s24 + $0x80] ss:$12 sps:$4 sm:$0xff]  }
 0x55b   : > { %v1197_v52 = vadd.f32 %v1195_v36, %v1193_v41  ;;  %v3950_v53 = vsel %vm1210_vm3, %v1196_v59, %v3790_v1  ;;  %v2462_v1 = vld [vmem:[%s3301_s24 + $0x78] sm:$0xff]  ;;  %v1221_v41 = vunpack.c.l.bf16 %v2463_v35  ;;  %v3998_v59 = vld [vmem:[%s4411_s2] ss:$0 sm:$0xff] }
 0x55c   : > { %v1219_v45 = vunpack.c.l.bf16 %v2462_v1  ;;  %v1220_v47 = vunpack.c.h.bf16 %v2462_v1  ;;  %v1224_v1 = vunpack.c.h.bf16 %v2463_v35 }
 0x55d   : > { %v3953_v42 = vsel %vm1211_vm4, %v1197_v52, %v3793_v57  ;;  %v2464_v57 = vld [vmem:[%s3301_s24 + $0x84] sm:$0xff] }
 0x55e   : > { %v1225_v43 = vpack.c.bf16 %v3953_v42, %v3950_v53  ;;  %v1222_v46 = vunpack.c.l.bf16 %v2464_v57  ;;  %v1223_v31 = vunpack.c.h.bf16 %v2464_v57 }
 0x560   : > { %1259 = vmatmul.mubr.bf16.vlgmr.msra.gmra.mrb[20].mxu0 %v1225_v43  ;;  %2747 = vmatmul.mubr.bf16.vlgmr.msra.gmra.mrb[20].mxu1 %v1225_v43 }
 0x561   : > { %1383 = vmatpush1.bf16.msra.mxu0 %v3740_v60  ;;  %2751 = vmatpush3.bf16.msra.mxu1 %v3801_v7 }
 0x562   : > { %1384 = vmatprep.subr.bf16.mxu0 %v3807_v55  ;;  %2752 = vmatprep.subr.bf16.mxu1 %v3248_v3 }
 0x563   : > { %1414 = vmatprep.mubr.bf16.mxu0 %v3249_v4  ;;  %2766 = vmatprep.mubr.msk.bf16.mxu1 %vm3250_vm0, %v3248_v3 }
 0x565   : > { %1385 = vmatpush1.bf16.msra.mxu0 %v3817_v56  ;;  %2753 = vmatpush3.bf16.msra.mxu1 %v3823_v8 }
 0x566   : > { %1386 = vmatprep.subr.bf16.mxu0 %v3829_v9  ;;  %2754 = vmatprep.subr.bf16.mxu1 %v3248_v3 }
 0x569   : > { %1387 = vmatpush1.bf16.msra.mxu0 %v3836_v10  ;;  %2755 = vmatpush3.bf16.msra.mxu1 %v3842_v11 }
 0x56a   : > { %1388 = vmatprep.subr.bf16.mxu0 %v3848_v12  ;;  %2756 = vmatprep.subr.bf16.mxu1 %v3248_v3 }
 0x56d   : > { %1389 = vmatpush1.bf16.msra.mxu0 %v3855_v13  ;;  %2757 = vmatpush3.bf16.msra.mxu1 %v3861_v14 }
 0x56e   : > { %1390 = vmatprep.subr.bf16.mxu0 %v3867_v15  ;;  %2758 = vmatprep.subr.bf16.mxu1 %v3248_v3 }
 0x571   : > { %1391 = vmatpush1.bf16.msra.mxu0 %v3874_v16  ;;  %2759 = vmatpush3.bf16.msra.mxu1 %v3880_v18 }
 0x572   : > { %1392 = vmatprep.subr.bf16.mxu0 %v3886_v19  ;;  %2760 = vmatprep.subr.bf16.mxu1 %v3248_v3 }
 0x575   : > { %1393 = vmatpush1.bf16.msra.mxu0 %v3893_v22  ;;  %2761 = vmatpush3.bf16.msra.mxu1 %v3899_v25 }
 0x576   : > { %1394 = vmatprep.subr.bf16.mxu0 %v3905_v26  ;;  %2762 = vmatprep.subr.bf16.mxu1 %v3248_v3 }
 0x579   : > { %1395 = vmatpush1.bf16.msra.mxu0 %v3912_v28  ;;  %2763 = vmatpush3.bf16.msra.mxu1 %v3918_v30 }
 0x57a   : > { %1396 = vmatprep.subr.bf16.mxu0 %v3924_v33  ;;  %2764 = vmatprep.subr.bf16.mxu1 %v3248_v3 }
 0x57d   : > { %1397 = vmatpush1.bf16.msra.mxu0 %v3931_v37  ;;  %2765 = vmatpush3.bf16.msra.mxu1 %v3937_v40 }
 0x57e   : > { %1538 = vmatprep.subr.bf16.mxu0 %v3778_v5  ;;  %2770 = vmatprep.subr.bf16.mxu1 %v3248_v3 }
 0x633   : > { %v1260_v21 = vpop.f32.mrb[20].mxu0  ;;  %v1303_v44 = vpop.f32.mrb[20].mxu1 }
 0x634   : > { %v1310_v48 = vadd.f32 %v1260_v21, %v1219_v45  ;;  %v1262_v50 = vpop.f32.mrb[21].mxu0  ;;  %v2748_v51 = vpop.f32.mrb[21].mxu1  ;;  %v1338_v29 = vadd.f32 %v3998_v59, %v1303_v44 }
 0x635   : > { %v1264_v54 = vpop.f32.mrb[22].mxu0  ;;  %v1306_v49 = vpop.f32.mrb[22].mxu1  ;;  %v1324_v61 = vadd.f32 %v1262_v50, %v1220_v47 }
 0x636   : > { %v2466_v32 = vmul.f32 -1.442695, %v1310_v48  ;;  %v1311_v6 = vadd.f32 %v1264_v54, %v1222_v46  ;;  %v1266_v38 = vpop.f32.mrb[23].mxu0  ;;  %v2749_v39 = vpop.f32.mrb[23].mxu1  ;;  %v1339_v57 = vadd.f32 %v3998_v59, %v1306_v49 }
 0x637   : > { %v1325_v63 = vadd.f32 %v1266_v38, %v1223_v31  ;;  %v2468_v20 = vmul.f32 -1.442695, %v1324_v61  ;;  %v1362_v61 = vpop.permute.xlu0 %1361 }
 0x638   : > { %3033 = vpow2.f32 %v2466_v32  ;;  %v2467_v62 = vmul.f32 -1.442695, %v1311_v6  ;;  %vm1366_vm5 = vcmp.eq.s32.totalorder %v1362_v61, 1 }
 0x639   : > { %v2469_v58 = vmul.f32 -1.442695, %v1325_v63 }
 0x63a   : > { %3035 = vpow2.f32 %v2467_v62  ;;  %v1365_v62 = vpop.permute.xlu1 %1364 }
 0x63b   : > { %3037 = vpow2.f32 %v2468_v20  ;;  %vm1367_vm6 = vcmp.eq.s32.totalorder %v1365_v62, 1 }
 0x63c   : > { %3039 = vpow2.f32 %v2469_v58 }
 0x642   : > { %v3034_v23 = vpop.eup %3033 }
 0x643   : > { %v1318_v24 = vadd.f32 1.0, %v3034_v23 }
 0x644   : > { %v3036_v27 = vpop.eup %3035 }
 0x645   : > { %3041 = vrcp.f32 %v1318_v24  ;;  %v1319_v0 = vadd.f32 1.0, %v3036_v27  ;;  %v3038_v17 = vpop.eup %3037 }
 0x646   : > { %v3040_v34 = vpop.eup %3039  ;;  %v1332_v36 = vadd.f32 1.0, %v3038_v17 }
 0x647   : > { %3043 = vrcp.f32 %v1319_v0  ;;  %v1333_v2 = vadd.f32 1.0, %v3040_v34 }
 0x648   : > { %3045 = vrcp.f32 %v1332_v36 }
 0x649   : > { %3047 = vrcp.f32 %v1333_v2 }
 0x64f   : > { %v3042_v52 = vpop.eup %3041 }
 0x650   : > { %v1340_v43 = vmul.f32 %v3042_v52, %v1338_v29 }
 0x651   : > { %v3044_v45 = vpop.eup %3043 }
 0x652   : > { %v1342_v46 = vadd.f32 %v1340_v43, %v1221_v41  ;;  %v1341_v21 = vmul.f32 %v3044_v45, %v1339_v57  ;;  %v3046_v48 = vpop.eup %3045 }
 0x653   : > { %v3048_v50 = vpop.eup %3047  ;;  %v1346_v51 = vsub.f32 1.0, %v3046_v48  ;;  %v1350_v44 = vmul.f32 %v3046_v48, %v3950_v53 }
 0x654   : > { %3049 = vtanh.f32 %v1342_v46  ;;  %v1343_v47 = vadd.f32 %v1341_v21, %v1224_v1  ;;  %v1347_v31 = vsub.f32 1.0, %v3048_v50  ;;  %v1351_v38 = vmul.f32 %v3048_v50, %v3953_v42 }
 0x656   : > { %3051 = vtanh.f32 %v1343_v47 }
 0x65e   : > { %v3050_v54 = vpop.eup %3049 }
 0x65f   : > { %v1348_v32 = vmul.f32 %v3050_v54, %v1346_v51 }
 0x660   : > { %v3052_v6 = vpop.eup %3051 }
 0x661   : > { %v1349_v39 = vmul.f32 %v3052_v6, %v1347_v31  ;;  %v1352_v49 = vadd.f32 %v1350_v44, %v1348_v32 }
 0x663   : > { %v1353_v63 = vadd.f32 %v1351_v38, %v1349_v39  ;;  %v4005_v20 = vsel %vm1366_vm5, %v1352_v49, %v3950_v53  ;;  %v2470_v53 = vld [vmem:[%s3301_s24 + $0x90] sm:$0xff]  ;;  %v2471_v38 = vld [vmem:[%s3301_s24 + $0x98] ss:$12 sps:$4 sm:$0xff]  }
 0x664   : > { %v1375_v24 = vunpack.c.l.bf16 %v2470_v53  ;;  %v1376_v34 = vunpack.c.h.bf16 %v2470_v53  ;;  %v1377_v49 = vunpack.c.l.bf16 %v2471_v38  ;;  %v1380_v53 = vunpack.c.h.bf16 %v2471_v38 }
 0x665   : > { %v4008_v58 = vsel %vm1367_vm6, %v1353_v63, %v3953_v42  ;;  %v2472_v42 = vld [vmem:[%s3301_s24 + $0x9c] sm:$0xff] }
 0x666   : > { %v1381_v23 = vpack.c.bf16 %v4008_v58, %v4005_v20  ;;  %v1378_v27 = vunpack.c.l.bf16 %v2472_v42  ;;  %v1379_v52 = vunpack.c.h.bf16 %v2472_v42 }
 0x668   : > { %1415 = vmatmul.mubr.bf16.vlgmr.msra.gmra.mrb[24].mxu0 %v1381_v23  ;;  %2767 = vmatmul.mubr.bf16.vlgmr.msra.gmra.mrb[24].mxu1 %v1381_v23 }
 0x669   : > { %1539 = vmatpush1.bf16.msra.mxu0 %v3740_v60  ;;  %2771 = vmatpush3.bf16.msra.mxu1 %v3801_v7 }
 0x66a   : > { %1540 = vmatprep.subr.bf16.mxu0 %v3807_v55  ;;  %2772 = vmatprep.subr.bf16.mxu1 %v3248_v3 }
 0x66b   : > { %1570 = vmatprep.mubr.bf16.mxu0 %v3249_v4  ;;  %2786 = vmatprep.mubr.msk.bf16.mxu1 %vm3250_vm0, %v3248_v3 }
 0x66d   : > { %1541 = vmatpush1.bf16.msra.mxu0 %v3817_v56  ;;  %2773 = vmatpush3.bf16.msra.mxu1 %v3823_v8 }
 0x66e   : > { %1542 = vmatprep.subr.bf16.mxu0 %v3829_v9  ;;  %2774 = vmatprep.subr.bf16.mxu1 %v3248_v3 }
 0x671   : > { %1543 = vmatpush1.bf16.msra.mxu0 %v3836_v10  ;;  %2775 = vmatpush3.bf16.msra.mxu1 %v3842_v11 }
 0x672   : > { %1544 = vmatprep.subr.bf16.mxu0 %v3848_v12  ;;  %2776 = vmatprep.subr.bf16.mxu1 %v3248_v3 }
 0x675   : > { %1545 = vmatpush1.bf16.msra.mxu0 %v3855_v13  ;;  %2777 = vmatpush3.bf16.msra.mxu1 %v3861_v14 }
 0x676   : > { %1546 = vmatprep.subr.bf16.mxu0 %v3867_v15  ;;  %2778 = vmatprep.subr.bf16.mxu1 %v3248_v3 }
 0x679   : > { %1547 = vmatpush1.bf16.msra.mxu0 %v3874_v16  ;;  %2779 = vmatpush3.bf16.msra.mxu1 %v3880_v18 }
 0x67a   : > { %1548 = vmatprep.subr.bf16.mxu0 %v3886_v19  ;;  %2780 = vmatprep.subr.bf16.mxu1 %v3248_v3 }
 0x67d   : > { %1549 = vmatpush1.bf16.msra.mxu0 %v3893_v22  ;;  %2781 = vmatpush3.bf16.msra.mxu1 %v3899_v25 }
 0x67e   : > { %1550 = vmatprep.subr.bf16.mxu0 %v3905_v26  ;;  %2782 = vmatprep.subr.bf16.mxu1 %v3248_v3 }
 0x681   : > { %1551 = vmatpush1.bf16.msra.mxu0 %v3912_v28  ;;  %2783 = vmatpush3.bf16.msra.mxu1 %v3918_v30 }
 0x682   : > { %1552 = vmatprep.subr.bf16.mxu0 %v3924_v33  ;;  %2784 = vmatprep.subr.bf16.mxu1 %v3248_v3 }
 0x685   : > { %1553 = vmatpush1.bf16.msra.mxu0 %v3931_v37  ;;  %2785 = vmatpush3.bf16.msra.mxu1 %v3937_v40 }
 0x686   : > { %1694 = vmatprep.subr.bf16.mxu0 %v3778_v5  ;;  %2790 = vmatprep.subr.bf16.mxu1 %v3248_v3 }
 0x73b   : > { %v1416_v0 = vpop.f32.mrb[24].mxu0  ;;  %v1459_v17 = vpop.f32.mrb[24].mxu1 }
 0x73c   : > { %v1466_v35 = vadd.f32 %v1416_v0, %v1375_v24  ;;  %v1418_v36 = vpop.f32.mrb[25].mxu0  ;;  %v2768_v41 = vpop.f32.mrb[25].mxu1  ;;  %v1494_v61 = vadd.f32 %v3998_v59, %v1459_v17 }
 0x73d   : > { %v1420_v29 = vpop.f32.mrb[26].mxu0  ;;  %v1462_v2 = vpop.f32.mrb[26].mxu1  ;;  %v1480_v46 = vadd.f32 %v1418_v36, %v1376_v34 }
 0x73e   : > { %v2474_v43 = vmul.f32 -1.442695, %v1466_v35  ;;  %v1467_v1 = vadd.f32 %v1420_v29, %v1378_v27  ;;  %v1422_v57 = vpop.f32.mrb[27].mxu0  ;;  %v2769_v45 = vpop.f32.mrb[27].mxu1  ;;  %v1495_v42 = vadd.f32 %v3998_v59, %v1462_v2 }
 0x73f   : > { %v1481_v47 = vadd.f32 %v1422_v57, %v1379_v52  ;;  %v2476_v48 = vmul.f32 -1.442695, %v1480_v46  ;;  %v1518_v46 = vpop.permute.xlu0 %1517 }
 0x740   : > { %3053 = vpow2.f32 %v2474_v43  ;;  %v2475_v21 = vmul.f32 -1.442695, %v1467_v1  ;;  %vm1522_vm7 = vcmp.eq.s32.totalorder %v1518_v46, 1 }
 0x741   : > { %v2477_v50 = vmul.f32 -1.442695, %v1481_v47 }
 0x742   : > { %3055 = vpow2.f32 %v2475_v21  ;;  %v1521_v21 = vpop.permute.xlu1 %1520 }
 0x743   : > { %3057 = vpow2.f32 %v2476_v48  ;;  %vm1523_vm8 = vcmp.eq.s32.totalorder %v1521_v21, 1 }
 0x744   : > { %3059 = vpow2.f32 %v2477_v50 }
 0x74a   : > { %v3054_v51 = vpop.eup %3053 }
 0x74b   : > { %v1474_v54 = vadd.f32 1.0, %v3054_v51 }
 0x74c   : > { %v3056_v44 = vpop.eup %3055 }
 0x74d   : > { %3061 = vrcp.f32 %v1474_v54  ;;  %v1475_v31 = vadd.f32 1.0, %v3056_v44  ;;  %v3058_v32 = vpop.eup %3057 }
 0x74e   : > { %v3060_v6 = vpop.eup %3059  ;;  %v1488_v39 = vadd.f32 1.0, %v3058_v32 }
 0x74f   : > { %3063 = vrcp.f32 %v1475_v31  ;;  %v1489_v62 = vadd.f32 1.0, %v3060_v6 }
 0x750   : > { %3065 = vrcp.f32 %v1488_v39 }
 0x751   : > { %3067 = vrcp.f32 %v1489_v62 }
 0x757   : > { %v3062_v63 = vpop.eup %3061 }
 0x758   : > { %v1496_v23 = vmul.f32 %v3062_v63, %v1494_v61 }
 0x759   : > { %v3064_v24 = vpop.eup %3063 }
 0x75a   : > { %v1498_v27 = vadd.f32 %v1496_v23, %v1377_v49  ;;  %v1497_v0 = vmul.f32 %v3064_v24, %v1495_v42  ;;  %v3066_v35 = vpop.eup %3065 }
 0x75b   : > { %v3068_v36 = vpop.eup %3067  ;;  %v1502_v41 = vsub.f32 1.0, %v3066_v35  ;;  %v1506_v17 = vmul.f32 %v3066_v35, %v4005_v20 }
 0x75c   : > { %3069 = vtanh.f32 %v1498_v27  ;;  %v1499_v34 = vadd.f32 %v1497_v0, %v1380_v53  ;;  %v1503_v52 = vsub.f32 1.0, %v3068_v36  ;;  %v1507_v57 = vmul.f32 %v3068_v36, %v4008_v58 }
 0x75e   : > { %3071 = vtanh.f32 %v1499_v34 }
 0x766   : > { %v3070_v29 = vpop.eup %3069 }
 0x767   : > { %v1504_v43 = vmul.f32 %v3070_v29, %v1502_v41 }
 0x768   : > { %v3072_v1 = vpop.eup %3071 }
 0x769   : > { %v1505_v45 = vmul.f32 %v3072_v1, %v1503_v52  ;;  %v1508_v2 = vadd.f32 %v1506_v17, %v1504_v43  ;;  %v2479_v43 = vld [vmem:[%s3301_s24 + $0xb0] ss:$12 sps:$4 sm:$0xff]  }
 0x76b   : > { %v1509_v47 = vadd.f32 %v1507_v57, %v1505_v45  ;;  %v4055_v48 = vsel %vm1522_vm7, %v1508_v2, %v4005_v20  ;;  %v2480_v20 = vld [vmem:[%s3301_s24 + $0xb4] sm:$0xff]  ;;  %v1533_v57 = vunpack.c.l.bf16 %v2479_v43 }
 0x76c   : > { %v1534_v54 = vunpack.c.l.bf16 %v2480_v20  ;;  %v1535_v62 = vunpack.c.h.bf16 %v2480_v20 }
 0x76d   : > { %v4058_v50 = vsel %vm1523_vm8, %v1509_v47, %v4008_v58  ;;  %v1536_v47 = vunpack.c.h.bf16 %v2479_v43 }
 0x76e   : > { %v1537_v51 = vpack.c.bf16 %v4058_v50, %v4055_v48 }
 0x770   : > { %1571 = vmatmul.mubr.bf16.vlgmr.msra.gmra.mrb[28].mxu0 %v1537_v51  ;;  %2787 = vmatmul.mubr.bf16.vlgmr.msra.gmra.mrb[28].mxu1 %v1537_v51 }
 0x771   : > { %1695 = vmatpush1.bf16.msra.mxu0 %v3740_v60  ;;  %2791 = vmatpush3.bf16.msra.mxu1 %v3801_v7  ;;  %v2478_v60 = vld [vmem:[%s3301_s24 + $0xa8] sm:$0xff] }
 0x772   : > { %1696 = vmatprep.subr.bf16.mxu0 %v3807_v55  ;;  %2792 = vmatprep.subr.bf16.mxu1 %v3248_v3  ;;  %v1531_v58 = vunpack.c.l.bf16 %v2478_v60  ;;  %v1532_v32 = vunpack.c.h.bf16 %v2478_v60 }
 0x773   : > { %1726 = vmatprep.mubr.bf16.mxu0 %v3249_v4  ;;  %2806 = vmatprep.mubr.msk.bf16.mxu1 %vm3250_vm0, %v3248_v3 }
 0x775   : > { %1697 = vmatpush1.bf16.msra.mxu0 %v3817_v56  ;;  %2793 = vmatpush3.bf16.msra.mxu1 %v3823_v8 }
 0x776   : > { %1698 = vmatprep.subr.bf16.mxu0 %v3829_v9  ;;  %2794 = vmatprep.subr.bf16.mxu1 %v3248_v3 }
 0x779   : > { %1699 = vmatpush1.bf16.msra.mxu0 %v3836_v10  ;;  %2795 = vmatpush3.bf16.msra.mxu1 %v3842_v11 }
 0x77a   : > { %1700 = vmatprep.subr.bf16.mxu0 %v3848_v12  ;;  %2796 = vmatprep.subr.bf16.mxu1 %v3248_v3 }
 0x77d   : > { %1701 = vmatpush1.bf16.msra.mxu0 %v3855_v13  ;;  %2797 = vmatpush3.bf16.msra.mxu1 %v3861_v14 }
 0x77e   : > { %1702 = vmatprep.subr.bf16.mxu0 %v3867_v15  ;;  %2798 = vmatprep.subr.bf16.mxu1 %v3248_v3 }
 0x781   : > { %1703 = vmatpush1.bf16.msra.mxu0 %v3874_v16  ;;  %2799 = vmatpush3.bf16.msra.mxu1 %v3880_v18 }
 0x782   : > { %1704 = vmatprep.subr.bf16.mxu0 %v3886_v19  ;;  %2800 = vmatprep.subr.bf16.mxu1 %v3248_v3 }
 0x785   : > { %1705 = vmatpush1.bf16.msra.mxu0 %v3893_v22  ;;  %2801 = vmatpush3.bf16.msra.mxu1 %v3899_v25 }
 0x786   : > { %1706 = vmatprep.subr.bf16.mxu0 %v3905_v26  ;;  %2802 = vmatprep.subr.bf16.mxu1 %v3248_v3 }
 0x789   : > { %1707 = vmatpush1.bf16.msra.mxu0 %v3912_v28  ;;  %2803 = vmatpush3.bf16.msra.mxu1 %v3918_v30 }
 0x78a   : > { %1708 = vmatprep.subr.bf16.mxu0 %v3924_v33  ;;  %2804 = vmatprep.subr.bf16.mxu1 %v3248_v3 }
 0x78d   : > { %1709 = vmatpush1.bf16.msra.mxu0 %v3931_v37  ;;  %2805 = vmatpush3.bf16.msra.mxu1 %v3937_v40 }
 0x78e   : > { %1850 = vmatprep.subr.bf16.mxu0 %v3778_v5  ;;  %2810 = vmatprep.subr.bf16.mxu1 %v3248_v3 }
 0x843   : > { %v1572_v44 = vpop.f32.mrb[28].mxu0  ;;  %v1615_v31 = vpop.f32.mrb[28].mxu1 }
 0x844   : > { %v1622_v6 = vadd.f32 %v1572_v44, %v1531_v58  ;;  %v1574_v38 = vpop.f32.mrb[29].mxu0  ;;  %v2788_v39 = vpop.f32.mrb[29].mxu1  ;;  %v1650_v45 = vadd.f32 %v3998_v59, %v1615_v31 }
 0x845   : > { %v1576_v49 = vpop.f32.mrb[30].mxu0  ;;  %v1618_v61 = vpop.f32.mrb[30].mxu1  ;;  %v1636_v5 = vadd.f32 %v1574_v38, %v1532_v32 }
 0x846   : > { %v2482_v63 = vmul.f32 -1.442695, %v1622_v6  ;;  %v1623_v23 = vadd.f32 %v1576_v49, %v1534_v54  ;;  %v1578_v53 = vpop.f32.mrb[31].mxu0  ;;  %v2789_v42 = vpop.f32.mrb[31].mxu1  ;;  %v1651_v51 = vadd.f32 %v3998_v59, %v1618_v61 }
 0x847   : > { %v1637_v27 = vadd.f32 %v1578_v53, %v1535_v62  ;;  %v2484_v0 = vmul.f32 -1.442695, %v1636_v5  ;;  %v1674_v53 = vpop.permute.xlu0 %1673  ;;  %v1677_v42 = vpop.permute.xlu1 %1676 }
 0x848   : > { %3073 = vpow2.f32 %v2482_v63  ;;  %v2483_v24 = vmul.f32 -1.442695, %v1623_v23  ;;  %vm1678_vm9 = vcmp.eq.s32.totalorder %v1674_v53, 1  ;;  %vm1679_vm10 = vcmp.eq.s32.totalorder %v1677_v42, 1 }
 0x849   : > { %v2485_v34 = vmul.f32 -1.442695, %v1637_v27 }
 0x84a   : > { %3075 = vpow2.f32 %v2483_v24 }
 0x84b   : > { %3077 = vpow2.f32 %v2484_v0  ;;  %v1833_v53 = vpop.permute.xlu1 %1832 }
 0x84c   : > { %3079 = vpow2.f32 %v2485_v34  ;;  %v4115_v34 = vld [vmem:[%s4410_s1] ss:$12 sps:$4 sm:$0xff]   ;;  %vm1835_vm12 = vcmp.eq.s32.totalorder %v1833_v53, 1 }
 0x852   : > { %v3074_v35 = vpop.eup %3073 }
 0x853   : > { %v1630_v36 = vadd.f32 1.0, %v3074_v35 }
 0x854   : > { %v3076_v41 = vpop.eup %3075 }
 0x855   : > { %3081 = vrcp.f32 %v1630_v36  ;;  %v1631_v29 = vadd.f32 1.0, %v3076_v41  ;;  %v3078_v17 = vpop.eup %3077 }
 0x856   : > { %v3080_v52 = vpop.eup %3079  ;;  %v1644_v1 = vadd.f32 1.0, %v3078_v17 }
 0x857   : > { %3083 = vrcp.f32 %v1631_v29  ;;  %v1645_v2 = vadd.f32 1.0, %v3080_v52  ;;  %v2487_v52 = vld [vmem:[%s3301_s24 + $0xc8] ss:$12 sps:$4 sm:$0xff]  }
 0x858   : > { %3085 = vrcp.f32 %v1644_v1  ;;  %v1689_v1 = vunpack.c.l.bf16 %v2487_v52 }
 0x859   : > { %3087 = vrcp.f32 %v1645_v2 }
 0x85f   : > { %v3082_v46 = vpop.eup %3081 }
 0x860   : > { %v1652_v21 = vmul.f32 %v3082_v46, %v1650_v45 }
 0x861   : > { %v3084_v60 = vpop.eup %3083 }
 0x862   : > { %v1654_v20 = vadd.f32 %v1652_v21, %v1533_v57  ;;  %v1653_v58 = vmul.f32 %v3084_v60, %v1651_v51  ;;  %v3086_v44 = vpop.eup %3085  ;;  %v1692_v21 = vunpack.c.h.bf16 %v2487_v52 }
 0x863   : > { %v3088_v32 = vpop.eup %3087  ;;  %v1658_v6 = vsub.f32 1.0, %v3086_v44  ;;  %v1662_v31 = vmul.f32 %v3086_v44, %v4055_v48 }
 0x864   : > { %3089 = vtanh.f32 %v1654_v20  ;;  %v1655_v54 = vadd.f32 %v1653_v58, %v1536_v47  ;;  %v1659_v39 = vsub.f32 1.0, %v3088_v32  ;;  %v1663_v63 = vmul.f32 %v3088_v32, %v4058_v50 }
 0x866   : > { %3091 = vtanh.f32 %v1655_v54 }
 0x86e   : > { %v3090_v38 = vpop.eup %3089 }
 0x86f   : > { %v1660_v49 = vmul.f32 %v3090_v38, %v1658_v6 }
 0x870   : > { %v3092_v62 = vpop.eup %3091 }
 0x871   : > { %v1661_v23 = vmul.f32 %v3092_v62, %v1659_v39  ;;  %v1664_v61 = vadd.f32 %v1662_v31, %v1660_v49 }
 0x873   : > { %v1665_v5 = vadd.f32 %v1663_v63, %v1661_v23  ;;  %v4105_v24 = vsel %vm1678_vm9, %v1664_v61, %v4055_v48  ;;  %v1830_v61 = vpop.permute.xlu0 %1829 }
 0x874   : > { %vm1834_vm11 = vcmp.eq.s32.totalorder %v1830_v61, 1 }
 0x875   : > { %v4108_v27 = vsel %vm1679_vm10, %v1665_v5, %v4058_v50 }
 0x876   : > { %v1693_v0 = vpack.c.bf16 %v4108_v27, %v4105_v24 }
 0x878   : > { %1727 = vmatmul.mubr.bf16.vlgmr.msra.gmra.mrb[32].mxu0 %v1693_v0  ;;  %2807 = vmatmul.mubr.bf16.vlgmr.msra.gmra.mrb[32].mxu1 %v1693_v0 }
 0x879   : > { %1851 = vmatpush1.bf16.msra.mxu0 %v4115_v34  ;;  %2811 = vmatpush3.bf16.msra.mxu1 %v3801_v7  ;;  %v4153_v7 = vld [vmem:[%s4410_s1 + $0x4] ss:$12 sps:$4 sm:$0xff]  }
 0x87a   : > { %1852 = vmatprep.subr.bf16.mxu0 %v3807_v55  ;;  %2812 = vmatprep.subr.bf16.mxu1 %v3248_v3  ;;  %v2486_v55 = vld [vmem:[%s3301_s24 + $0xc0] sm:$0xff] }
 0x87b   : > { %1882 = vmatprep.mubr.bf16.mxu0 %v3249_v4  ;;  %2826 = vmatprep.mubr.msk.bf16.mxu1 %vm3250_vm0, %v3248_v3 }
 0x87d   : > { %1853 = vmatpush1.bf16.msra.mxu0 %v3817_v56  ;;  %2813 = vmatpush3.bf16.msra.mxu1 %v3823_v8  ;;  %v2488_v56 = vld [vmem:[%s3301_s24 + $0xcc] sm:$0xff]  ;;  %v1687_v8 = vunpack.c.l.bf16 %v2486_v55 }
 0x87e   : > { %1854 = vmatprep.subr.bf16.mxu0 %v3829_v9  ;;  %2814 = vmatprep.subr.bf16.mxu1 %v3248_v3  ;;  %v1690_v9 = vunpack.c.l.bf16 %v2488_v56 }
 0x881   : > { %1855 = vmatpush1.bf16.msra.mxu0 %v3836_v10  ;;  %2815 = vmatpush3.bf16.msra.mxu1 %v3842_v11 }
 0x882   : > { %1856 = vmatprep.subr.bf16.mxu0 %v3848_v12  ;;  %2816 = vmatprep.subr.bf16.mxu1 %v3248_v3  ;;  %v1688_v12 = vunpack.c.h.bf16 %v2486_v55 }
 0x885   : > { %1857 = vmatpush1.bf16.msra.mxu0 %v3855_v13  ;;  %2817 = vmatpush3.bf16.msra.mxu1 %v3861_v14 }
 0x886   : > { %1858 = vmatprep.subr.bf16.mxu0 %v3867_v15  ;;  %2818 = vmatprep.subr.bf16.mxu1 %v3248_v3 }
 0x889   : > { %1859 = vmatpush1.bf16.msra.mxu0 %v3874_v16  ;;  %2819 = vmatpush3.bf16.msra.mxu1 %v3880_v18 }
 0x88a   : > { %1860 = vmatprep.subr.bf16.mxu0 %v3886_v19  ;;  %2820 = vmatprep.subr.bf16.mxu1 %v3248_v3  ;;  %v1691_v19 = vunpack.c.h.bf16 %v2488_v56  ;;  %v4176_v56 = vld [vmem:[%s4410_s1 + $0x8] ss:$12 sps:$4 sm:$0xff]  }
 0x88d   : > { %1861 = vmatpush1.bf16.msra.mxu0 %v3893_v22  ;;  %2821 = vmatpush3.bf16.msra.mxu1 %v3899_v25 }
 0x88e   : > { %1862 = vmatprep.subr.bf16.mxu0 %v3905_v26  ;;  %2822 = vmatprep.subr.bf16.mxu1 %v3248_v3 }
 0x891   : > { %1863 = vmatpush1.bf16.msra.mxu0 %v3912_v28  ;;  %2823 = vmatpush3.bf16.msra.mxu1 %v3918_v30 }
 0x892   : > { %1864 = vmatprep.subr.bf16.mxu0 %v3924_v33  ;;  %2824 = vmatprep.subr.bf16.mxu1 %v3248_v3 }
 0x895   : > { %1865 = vmatpush1.bf16.msra.mxu0 %v3931_v37  ;;  %2825 = vmatpush3.bf16.msra.mxu1 %v3937_v40 }
 0x896   : > { %2006 = vmatprep.subr.bf16.mxu0 %v4153_v7  ;;  %2830 = vmatprep.subr.bf16.mxu1 %v3248_v3 }
 0x94b   : > { %v1728_v10 = vpop.f32.mrb[32].mxu0  ;;  %v1771_v11 = vpop.f32.mrb[32].mxu1 }
 0x94c   : > { %v1778_v13 = vadd.f32 %v1728_v10, %v1687_v8  ;;  %v1730_v14 = vpop.f32.mrb[33].mxu0  ;;  %v2808_v15 = vpop.f32.mrb[33].mxu1  ;;  %v1806_v57 = vadd.f32 %v3998_v59, %v1771_v11  ;;  %v4198_v8 = vld [vmem:[%s4410_s1 + $0x20] ss:$12 sps:$4 sm:$0xff]   ;;  %v4211_v10 = vld [vmem:[%s4410_s1 + $0x30] ss:$12 sps:$4 sm:$0xff]  }
 0x94d   : > { %v1732_v16 = vpop.f32.mrb[34].mxu0  ;;  %v1774_v18 = vpop.f32.mrb[34].mxu1  ;;  %v1792_v30 = vadd.f32 %v1730_v14, %v1688_v12  ;;  %v4217_v11 = vld [vmem:[%s4410_s1 + $0x38] ss:$12 sps:$4 sm:$0xff]   ;;  %v4236_v14 = vld [vmem:[%s4410_s1 + $0x50] ss:$12 sps:$4 sm:$0xff]  }
 0x94e   : > { %v2490_v22 = vmul.f32 -1.442695, %v1778_v13  ;;  %v1779_v25 = vadd.f32 %v1732_v16, %v1690_v9  ;;  %v1734_v26 = vpop.f32.mrb[35].mxu0  ;;  %v2809_v28 = vpop.f32.mrb[35].mxu1  ;;  %v1807_v47 = vadd.f32 %v3998_v59, %v1774_v18  ;;  %v4204_v9 = vld [vmem:[%s4410_s1 + $0x34] ss:$12 sps:$4 sm:$0xff]  }
 0x94f   : > { %v1793_v37 = vadd.f32 %v1734_v26, %v1691_v19  ;;  %v2492_v40 = vmul.f32 -1.442695, %v1792_v30  ;;  %v4223_v12 = vld [vmem:[%s4410_s1 + $0x4c] ss:$12 sps:$4 sm:$0xff]   ;;  %v4230_v13 = vld [vmem:[%s4410_s1 + $0x48] ss:$12 sps:$4 sm:$0xff]  }
 0x950   : > { %3093 = vpow2.f32 %v2490_v22  ;;  %v2491_v33 = vmul.f32 -1.442695, %v1779_v25  ;;  %v4242_v15 = vld [vmem:[%s4410_s1 + $0x64] ss:$12 sps:$4 sm:$0xff]   ;;  %v4249_v16 = vld [vmem:[%s4410_s1 + $0x60] ss:$12 sps:$4 sm:$0xff]  }
 0x951   : > { %v2493_v48 = vmul.f32 -1.442695, %v1793_v37  ;;  %v4255_v18 = vld [vmem:[%s4410_s1 + $0x68] ss:$12 sps:$4 sm:$0xff]   ;;  %v4268_v22 = vld [vmem:[%s4410_s1 + $0x78] ss:$12 sps:$4 sm:$0xff]  }
 0x952   : > { %3095 = vpow2.f32 %v2491_v33  ;;  %v4261_v19 = vld [vmem:[%s4410_s1 + $0x7c] ss:$12 sps:$4 sm:$0xff]   ;;  %v4274_v25 = vld [vmem:[%s4410_s1 + $0x80] ss:$12 sps:$4 sm:$0xff]   ;;  %v4293_v30 = vld [vmem:[%s4410_s1 + $0x98] ss:$12 sps:$4 sm:$0xff]  }
 0x953   : > { %3097 = vpow2.f32 %v2492_v40  ;;  %v4280_v26 = vld [vmem:[%s4410_s1 + $0x94] ss:$12 sps:$4 sm:$0xff]   ;;  %v4287_v28 = vld [vmem:[%s4410_s1 + $0x90] ss:$12 sps:$4 sm:$0xff]   ;;  %v4299_v33 = vld [vmem:[%s4410_s1 + $0xac] ss:$12 sps:$4 sm:$0xff]  }
 0x954   : > { %3099 = vpow2.f32 %v2493_v48  ;;  %v4306_v37 = vld [vmem:[%s4410_s1 + $0xa8] ss:$12 sps:$4 sm:$0xff]   ;;  %v4312_v40 = vld [vmem:[%s4410_s1 + $0xb0] ss:$12 sps:$4 sm:$0xff]  }
 0x955   : > { %v2494_v48 = vld [vmem:[%s3301_s24 + $0xd8] sm:$0xff] }
 0x95a   : > { %v3094_v50 = vpop.eup %3093 }
 0x95b   : > { %v1786_v35 = vadd.f32 1.0, %v3094_v50  ;;  %v2496_v50 = vld [vmem:[%s3301_s24 + $0xe4] sm:$0xff] }
 0x95c   : > { %v3096_v36 = vpop.eup %3095 }
 0x95d   : > { %3101 = vrcp.f32 %v1786_v35  ;;  %v1787_v41 = vadd.f32 1.0, %v3096_v36  ;;  %v3098_v29 = vpop.eup %3097  ;;  %v1843_v35 = vunpack.c.l.bf16 %v2494_v48  ;;  %v1846_v36 = vunpack.c.l.bf16 %v2496_v50 }
 0x95e   : > { %v3100_v17 = vpop.eup %3099  ;;  %v1800_v43 = vadd.f32 1.0, %v3098_v29 }
 0x95f   : > { %3103 = vrcp.f32 %v1787_v41  ;;  %v1801_v45 = vadd.f32 1.0, %v3100_v17  ;;  %v1844_v17 = vunpack.c.h.bf16 %v2494_v48 }
 0x960   : > { %3105 = vrcp.f32 %v1800_v43 }
 0x961   : > { %3107 = vrcp.f32 %v1801_v45 }
 0x967   : > { %v3102_v2 = vpop.eup %3101 }
 0x968   : > { %v1808_v46 = vmul.f32 %v3102_v2, %v1806_v57  ;;  %v1847_v2 = vunpack.c.h.bf16 %v2496_v50 }
 0x969   : > { %v3104_v51 = vpop.eup %3103 }
 0x96a   : > { %v1810_v60 = vadd.f32 %v1808_v46, %v1689_v1  ;;  %v1809_v20 = vmul.f32 %v3104_v51, %v1807_v47  ;;  %v3106_v54 = vpop.eup %3105 }
 0x96b   : > { %v3108_v44 = vpop.eup %3107  ;;  %v1814_v32 = vsub.f32 1.0, %v3106_v54  ;;  %v1818_v38 = vmul.f32 %v3106_v54, %v4105_v24 }
 0x96c   : > { %3109 = vtanh.f32 %v1810_v60  ;;  %v1811_v58 = vadd.f32 %v1809_v20, %v1692_v21  ;;  %v1815_v31 = vsub.f32 1.0, %v3108_v44  ;;  %v1819_v62 = vmul.f32 %v3108_v44, %v4108_v27 }
 0x96e   : > { %3111 = vtanh.f32 %v1811_v58 }
 0x976   : > { %v3110_v6 = vpop.eup %3109 }
 0x977   : > { %v1816_v39 = vmul.f32 %v3110_v6, %v1814_v32 }
 0x978   : > { %v3112_v49 = vpop.eup %3111 }
 0x979   : > { %v1817_v63 = vmul.f32 %v3112_v49, %v1815_v31  ;;  %v1820_v23 = vadd.f32 %v1818_v38, %v1816_v39  ;;  %v2495_v49 = vld [vmem:[%s3301_s24 + $0xe0] ss:$12 sps:$4 sm:$0xff]  }
 0x97b   : > { %v1821_v42 = vadd.f32 %v1819_v62, %v1817_v63  ;;  %v4165_v5 = vsel %vm1834_vm11, %v1820_v23, %v4105_v24  ;;  %v4182_v24 = vld [vmem:[%s4410_s1 + $0x1c] ss:$12 sps:$4 sm:$0xff]   ;;  %v1845_v63 = vunpack.c.l.bf16 %v2495_v49 }
 0x97d   : > { %v4168_v0 = vsel %vm1835_vm12, %v1821_v42, %v4108_v27  ;;  %v4192_v27 = vld [vmem:[%s4410_s1 + $0x18] ss:$12 sps:$4 sm:$0xff]  }
 0x97e   : > { %v1849_v55 = vpack.c.bf16 %v4168_v0, %v4165_v5 }
 0x980   : > { %1883 = vmatmul.mubr.bf16.vlgmr.msra.gmra.mrb[36].mxu0 %v1849_v55  ;;  %2827 = vmatmul.mubr.bf16.vlgmr.msra.gmra.mrb[36].mxu1 %v1849_v55  ;;  %v1848_v55 = vunpack.c.h.bf16 %v2495_v49 }
 0x981   : > { %2007 = vmatpush1.bf16.msra.mxu0 %v4115_v34  ;;  %2831 = vmatpush3.bf16.msra.mxu1 %v4176_v56 }
 0x982   : > { %2008 = vmatprep.subr.bf16.mxu0 %v4182_v24  ;;  %2832 = vmatprep.subr.bf16.mxu1 %v3248_v3 }
 0x983   : > { %2038 = vmatprep.mubr.bf16.mxu0 %v3249_v4  ;;  %2846 = vmatprep.mubr.msk.bf16.mxu1 %vm3250_vm0, %v3248_v3 }
 0x985   : > { %2009 = vmatpush1.bf16.msra.mxu0 %v4192_v27  ;;  %2833 = vmatpush3.bf16.msra.mxu1 %v4198_v8 }
 0x986   : > { %2010 = vmatprep.subr.bf16.mxu0 %v4204_v9  ;;  %2834 = vmatprep.subr.bf16.mxu1 %v3248_v3 }
 0x989   : > { %2011 = vmatpush1.bf16.msra.mxu0 %v4211_v10  ;;  %2835 = vmatpush3.bf16.msra.mxu1 %v4217_v11 }
 0x98a   : > { %2012 = vmatprep.subr.bf16.mxu0 %v4223_v12  ;;  %2836 = vmatprep.subr.bf16.mxu1 %v3248_v3 }
 0x98d   : > { %2013 = vmatpush1.bf16.msra.mxu0 %v4230_v13  ;;  %2837 = vmatpush3.bf16.msra.mxu1 %v4236_v14 }
 0x98e   : > { %2014 = vmatprep.subr.bf16.mxu0 %v4242_v15  ;;  %2838 = vmatprep.subr.bf16.mxu1 %v3248_v3 }
 0x991   : > { %2015 = vmatpush1.bf16.msra.mxu0 %v4249_v16  ;;  %2839 = vmatpush3.bf16.msra.mxu1 %v4255_v18 }
 0x992   : > { %2016 = vmatprep.subr.bf16.mxu0 %v4261_v19  ;;  %2840 = vmatprep.subr.bf16.mxu1 %v3248_v3 }
 0x995   : > { %2017 = vmatpush1.bf16.msra.mxu0 %v4268_v22  ;;  %2841 = vmatpush3.bf16.msra.mxu1 %v4274_v25 }
 0x996   : > { %2018 = vmatprep.subr.bf16.mxu0 %v4280_v26  ;;  %2842 = vmatprep.subr.bf16.mxu1 %v3248_v3 }
 0x999   : > { %2019 = vmatpush1.bf16.msra.mxu0 %v4287_v28  ;;  %2843 = vmatpush3.bf16.msra.mxu1 %v4293_v30 }
 0x99a   : > { %2020 = vmatprep.subr.bf16.mxu0 %v4299_v33  ;;  %2844 = vmatprep.subr.bf16.mxu1 %v3248_v3 }
 0x99d   : > { %2021 = vmatpush1.bf16.msra.mxu0 %v4306_v37  ;;  %2845 = vmatpush3.bf16.msra.mxu1 %v4312_v40 }
 0x99e   : > { %2162 = vmatprep.subr.bf16.mxu0 %v4153_v7  ;;  %2850 = vmatprep.subr.bf16.mxu1 %v3248_v3 }
 0xa53   : > { %v1884_v41 = vpop.f32.mrb[36].mxu0  ;;  %v1927_v29 = vpop.f32.mrb[36].mxu1 }
 0xa54   : > { %v1934_v52 = vadd.f32 %v1884_v41, %v1843_v35  ;;  %v1886_v43 = vpop.f32.mrb[37].mxu0  ;;  %v2828_v1 = vpop.f32.mrb[37].mxu1  ;;  %v1962_v23 = vadd.f32 %v3998_v59, %v1927_v29 }
 0xa55   : > { %v1888_v57 = vpop.f32.mrb[38].mxu0  ;;  %v1930_v45 = vpop.f32.mrb[38].mxu1  ;;  %v1948_v7 = vadd.f32 %v1886_v43, %v1844_v17 }
 0xa56   : > { %v2498_v46 = vmul.f32 -1.442695, %v1934_v52  ;;  %v1935_v21 = vadd.f32 %v1888_v57, %v1846_v36  ;;  %v1890_v47 = vpop.f32.mrb[39].mxu0  ;;  %v2829_v51 = vpop.f32.mrb[39].mxu1  ;;  %v1963_v48 = vadd.f32 %v3998_v59, %v1930_v45 }
 0xa57   : > { %v1949_v20 = vadd.f32 %v1890_v47, %v1847_v2  ;;  %v2500_v58 = vmul.f32 -1.442695, %v1948_v7  ;;  %v1986_v45 = vpop.permute.xlu0 %1985  ;;  %v1989_v51 = vpop.permute.xlu1 %1988 }
 0xa58   : > { %3113 = vpow2.f32 %v2498_v46  ;;  %v2499_v60 = vmul.f32 -1.442695, %v1935_v21  ;;  %vm1990_vm13 = vcmp.eq.s32.totalorder %v1986_v45, 1  ;;  %vm1991_vm14 = vcmp.eq.s32.totalorder %v1989_v51, 1  ;;  %v2510_v51 = vld [vmem:[%s3301_s24 + $0x108] sm:$0xff] }
 0xa59   : > { %v2501_v54 = vmul.f32 -1.442695, %v1949_v20 }
 0xa5a   : > { %3115 = vpow2.f32 %v2499_v60 }
 0xa5b   : > { %3117 = vpow2.f32 %v2500_v58 }
 0xa5c   : > { %3119 = vpow2.f32 %v2501_v54 }
 0xa62   : > { %v3114_v44 = vpop.eup %3113 }
 0xa63   : > { %v1942_v32 = vadd.f32 1.0, %v3114_v44  ;;  %v2503_v44 = vld [vmem:[%s3301_s24 + $0xf8] ss:$12 sps:$4 sm:$0xff]  }
 0xa64   : > { %v3116_v6 = vpop.eup %3115 }
 0xa65   : > { %3121 = vrcp.f32 %v1942_v32  ;;  %v1943_v38 = vadd.f32 1.0, %v3116_v6  ;;  %v3118_v31 = vpop.eup %3117  ;;  %v2001_v6 = vunpack.c.l.bf16 %v2503_v44 }
 0xa66   : > { %v3120_v39 = vpop.eup %3119  ;;  %v1956_v62 = vadd.f32 1.0, %v3118_v31 }
 0xa67   : > { %3123 = vrcp.f32 %v1943_v38  ;;  %v1957_v61 = vadd.f32 1.0, %v3120_v39  ;;  %v4371_v38 = vld [vmem:[%s4411_s2] ss:$0 sm:$0xff] }
 0xa68   : > { %3125 = vrcp.f32 %v1956_v62 }
 0xa69   : > { %3127 = vrcp.f32 %v1957_v61 }
 0xa6f   : > { %v3122_v53 = vpop.eup %3121 }
 0xa70   : > { %v1964_v42 = vmul.f32 %v3122_v53, %v1962_v23 }
 0xa71   : > { %v3124_v50 = vpop.eup %3123 }
 0xa72   : > { %v1966_v35 = vadd.f32 %v1964_v42, %v1845_v63  ;;  %v1965_v36 = vmul.f32 %v3124_v50, %v1963_v48  ;;  %v3126_v17 = vpop.eup %3125  ;;  %v2004_v63 = vunpack.c.h.bf16 %v2503_v44 }
 0xa73   : > { %v3128_v52 = vpop.eup %3127  ;;  %v1970_v43 = vsub.f32 1.0, %v3126_v17  ;;  %v1974_v29 = vmul.f32 %v3126_v17, %v4165_v5 }
 0xa74   : > { %3129 = vtanh.f32 %v1966_v35  ;;  %v1967_v41 = vadd.f32 %v1965_v36, %v1848_v55  ;;  %v1971_v57 = vsub.f32 1.0, %v3128_v52  ;;  %v1975_v21 = vmul.f32 %v3128_v52, %v4168_v0 }
 0xa76   : > { %3131 = vtanh.f32 %v1967_v41 }
 0xa7e   : > { %v3130_v1 = vpop.eup %3129 }
 0xa7f   : > { %v1972_v2 = vmul.f32 %v3130_v1, %v1970_v43 }
 0xa80   : > { %v3132_v46 = vpop.eup %3131 }
 0xa81   : > { %v1973_v47 = vmul.f32 %v3132_v46, %v1971_v57  ;;  %v1976_v59 = vadd.f32 %v1974_v29, %v1972_v2  ;;  %v2142_v2 = vpop.permute.xlu0 %2141  ;;  %v2145_v46 = vpop.permute.xlu1 %2144 }
 0xa82   : > { %vm2147_vm15 = vcmp.eq.s32.totalorder %v2145_v46, 1 }
 0xa83   : > { %v1977_v7 = vadd.f32 %v1975_v21, %v1973_v47  ;;  %v4325_v60 = vsel %vm1990_vm13, %v1976_v59, %v4165_v5 }
 0xa85   : > { %v4328_v20 = vsel %vm1991_vm14, %v1977_v7, %v4168_v0  ;;  %v2512_v7 = vld [vmem:[%s3301_s24 + $0x114] sm:$0xff] }
 0xa86   : > { %v2005_v58 = vpack.c.bf16 %v4328_v20, %v4325_v60 }
 0xa88   : > { %2039 = vmatmul.mubr.bf16.vlgmr.msra.gmra.mrb[40].mxu0 %v2005_v58  ;;  %2847 = vmatmul.mubr.bf16.vlgmr.msra.gmra.mrb[40].mxu1 %v2005_v58  ;;  %v2155_v58 = vunpack.c.l.bf16 %v2510_v51 }
 0xa89   : > { %2163 = vmatpush1.bf16.msra.mxu0 %v4115_v34  ;;  %2851 = vmatpush3.bf16.msra.mxu1 %v4176_v56  ;;  %v2504_v34 = vld [vmem:[%s3301_s24 + $0xfc] sm:$0xff] }
 0xa8a   : > { %2164 = vmatprep.subr.bf16.mxu0 %v4182_v24  ;;  %2852 = vmatprep.subr.bf16.mxu1 %v3248_v3  ;;  %v2002_v0 = vunpack.c.l.bf16 %v2504_v34 }
 0xa8b   : > { %2194 = vmatprep.mubr.bf16.mxu0 %v3249_v4  ;;  %2866 = vmatprep.mubr.msk.bf16.mxu1 %vm3250_vm0, %v3248_v3  ;;  %v2502_v4 = vld [vmem:[%s3301_s24 + $0xf0] sm:$0xff]  ;;  %vm2146_vm0 = vcmp.eq.s32.totalorder %v2142_v2, 1 }
 0xa8c   : > { %v1999_v5 = vunpack.c.l.bf16 %v2502_v4 }
 0xa8d   : > { %2165 = vmatpush1.bf16.msra.mxu0 %v4192_v27  ;;  %2853 = vmatpush3.bf16.msra.mxu1 %v4198_v8  ;;  %v2000_v27 = vunpack.c.h.bf16 %v2502_v4  ;;  %v2158_v4 = vunpack.c.l.bf16 %v2512_v7 }
 0xa8e   : > { %2166 = vmatprep.subr.bf16.mxu0 %v4204_v9  ;;  %2854 = vmatprep.subr.bf16.mxu1 %v3248_v3 }
 0xa91   : > { %2167 = vmatpush1.bf16.msra.mxu0 %v4211_v10  ;;  %2855 = vmatpush3.bf16.msra.mxu1 %v4217_v11 }
 0xa92   : > { %2168 = vmatprep.subr.bf16.mxu0 %v4223_v12  ;;  %2856 = vmatprep.subr.bf16.mxu1 %v3248_v3 }
 0xa95   : > { %2169 = vmatpush1.bf16.msra.mxu0 %v4230_v13  ;;  %2857 = vmatpush3.bf16.msra.mxu1 %v4236_v14  ;;  %v2003_v13 = vunpack.c.h.bf16 %v2504_v34 }
 0xa96   : > { %2170 = vmatprep.subr.bf16.mxu0 %v4242_v15  ;;  %2858 = vmatprep.subr.bf16.mxu1 %v3248_v3 }
 0xa99   : > { %2171 = vmatpush1.bf16.msra.mxu0 %v4249_v16  ;;  %2859 = vmatpush3.bf16.msra.mxu1 %v4255_v18 }
 0xa9a   : > { %2172 = vmatprep.subr.bf16.mxu0 %v4261_v19  ;;  %2860 = vmatprep.subr.bf16.mxu1 %v3248_v3 }
 0xa9d   : > { %2173 = vmatpush1.bf16.msra.mxu0 %v4268_v22  ;;  %2861 = vmatpush3.bf16.msra.mxu1 %v4274_v25 }
 0xa9e   : > { %2174 = vmatprep.subr.bf16.mxu0 %v4280_v26  ;;  %2862 = vmatprep.subr.bf16.mxu1 %v3248_v3 }
 0xaa1   : > { %2175 = vmatpush1.bf16.msra.mxu0 %v4287_v28  ;;  %2863 = vmatpush3.bf16.msra.mxu1 %v4293_v30 }
 0xaa2   : > { %2176 = vmatprep.subr.bf16.mxu0 %v4299_v33  ;;  %2864 = vmatprep.subr.bf16.mxu1 %v3248_v3 }
 0xaa5   : > { %2177 = vmatpush1.bf16.msra.mxu0 %v4306_v37  ;;  %2865 = vmatpush3.bf16.msra.mxu1 %v4312_v40 }
 0xb5b   : > { %v2040_v56 = vpop.f32.mrb[40].mxu0  ;;  %v2083_v24 = vpop.f32.mrb[40].mxu1 }
 0xb5c   : > { %v2090_v8 = vadd.f32 %v2040_v56, %v1999_v5  ;;  %v2042_v9 = vpop.f32.mrb[41].mxu0  ;;  %v2848_v10 = vpop.f32.mrb[41].mxu1  ;;  %v2118_v31 = vadd.f32 %v4371_v38, %v2083_v24 }
 0xb5d   : > { %v2044_v11 = vpop.f32.mrb[42].mxu0  ;;  %v2086_v12 = vpop.f32.mrb[42].mxu1  ;;  %v2104_v18 = vadd.f32 %v2042_v9, %v2000_v27  ;;  %v2159_v9 = vunpack.c.h.bf16 %v2512_v7 }
 0xb5e   : > { %v2506_v14 = vmul.f32 -1.442695, %v2090_v8  ;;  %v2091_v15 = vadd.f32 %v2044_v11, %v2002_v0  ;;  %v2046_v3 = vpop.f32.mrb[43].mxu0  ;;  %v2849_v16 = vpop.f32.mrb[43].mxu1  ;;  %v2119_v23 = vadd.f32 %v4371_v38, %v2086_v12  ;;  %v2156_v0 = vunpack.c.h.bf16 %v2510_v51 }
 0xb5f   : > { %v2105_v22 = vadd.f32 %v2046_v3, %v2003_v13  ;;  %v2508_v25 = vmul.f32 -1.442695, %v2104_v18 }
 0xb60   : > { %3133 = vpow2.f32 %v2506_v14  ;;  %v2507_v19 = vmul.f32 -1.442695, %v2091_v15 }
 0xb61   : > { %v2509_v26 = vmul.f32 -1.442695, %v2105_v22 }
 0xb62   : > { %3135 = vpow2.f32 %v2507_v19 }
 0xb63   : > { %3137 = vpow2.f32 %v2508_v25 }
 0xb64   : > { %3139 = vpow2.f32 %v2509_v26 }
 0xb6a   : > { %v3134_v28 = vpop.eup %3133 }
 0xb6b   : > { %v2098_v30 = vadd.f32 1.0, %v3134_v28 }
 0xb6c   : > { %v3136_v33 = vpop.eup %3135 }
 0xb6d   : > { %3141 = vrcp.f32 %v2098_v30  ;;  %v2099_v37 = vadd.f32 1.0, %v3136_v33  ;;  %v3138_v40 = vpop.eup %3137  ;;  %v2511_v30 = vld [vmem:[%s3301_s24 + $0x110] ss:$12 sps:$4 sm:$0xff]  }
 0xb6e   : > { %v3140_v54 = vpop.eup %3139  ;;  %v2112_v32 = vadd.f32 1.0, %v3138_v40 }
 0xb6f   : > { %3143 = vrcp.f32 %v2099_v37  ;;  %v2113_v39 = vadd.f32 1.0, %v3140_v54  ;;  %v2157_v37 = vunpack.c.l.bf16 %v2511_v30 }
 0xb70   : > { %3145 = vrcp.f32 %v2112_v32 }
 0xb71   : > { %3147 = vrcp.f32 %v2113_v39 }
 0xb77   : > { %v3142_v49 = vpop.eup %3141 }
 0xb78   : > { %v2120_v62 = vmul.f32 %v3142_v49, %v2118_v31 }
 0xb79   : > { %v3144_v61 = vpop.eup %3143 }
 0xb7a   : > { %v2122_v53 = vadd.f32 %v2120_v62, %v2001_v6  ;;  %v2121_v42 = vmul.f32 %v3144_v61, %v2119_v23  ;;  %v3146_v48 = vpop.eup %3145  ;;  %v2160_v6 = vunpack.c.h.bf16 %v2511_v30 }
 0xb7b   : > { %v3148_v50 = vpop.eup %3147  ;;  %v2126_v35 = vsub.f32 1.0, %v3146_v48  ;;  %v2130_v41 = vmul.f32 %v3146_v48, %v4325_v60 }
 0xb7c   : > { %3149 = vtanh.f32 %v2122_v53  ;;  %v2123_v55 = vadd.f32 %v2121_v42, %v2004_v63  ;;  %v2127_v17 = vsub.f32 1.0, %v3148_v50  ;;  %v2131_v1 = vmul.f32 %v3148_v50, %v4328_v20 }
 0xb7e   : > { %3151 = vtanh.f32 %v2123_v55  ;;  %v2298_v55 = vpop.permute.xlu0 %2297 }
 0xb7f   : > { %vm2302_vm1 = vcmp.eq.s32.totalorder %v2298_v55, 1 }
 0xb86   : > { %v3150_v36 = vpop.eup %3149 }
 0xb87   : > { %v2128_v52 = vmul.f32 %v3150_v36, %v2126_v35 }
 0xb88   : > { %v3152_v43 = vpop.eup %3151 }
 0xb89   : > { %v2129_v29 = vmul.f32 %v3152_v43, %v2127_v17  ;;  %v2132_v57 = vadd.f32 %v2130_v41, %v2128_v52  ;;  %v2301_v41 = vpop.permute.xlu1 %2300 }
 0xb8a   : > { %vm2303_vm2 = vcmp.eq.s32.totalorder %v2301_v41, 1 }
 0xb8b   : > { %v2133_v21 = vadd.f32 %v2131_v1, %v2129_v29  ;;  %v4378_v47 = vsel %vm2146_vm0, %v2132_v57, %v4325_v60 }
 0xb8d   : > { %v4381_v59 = vsel %vm2147_vm15, %v2133_v21, %v4328_v20 }
 0xb8e   : > { %v2161_v45 = vpack.c.bf16 %v4381_v59, %v4378_v47 }
 0xb90   : > { %2195 = vmatmul.mubr.bf16.vlgmr.msra.gmra.mrb[44].mxu0 %v2161_v45  ;;  %2867 = vmatmul.mubr.bf16.vlgmr.msra.gmra.mrb[44].mxu1 %v2161_v45 }
 0xc63   : > { %v2196_v34 = vpop.f32.mrb[44].mxu0  ;;  %v2239_v5 = vpop.f32.mrb[44].mxu1 }
 0xc64   : > { %v2246_v56 = vadd.f32 %v2196_v34, %v2155_v58  ;;  %v2198_v24 = vpop.f32.mrb[45].mxu0  ;;  %v2868_v27 = vpop.f32.mrb[45].mxu1  ;;  %v2274_v40 = vadd.f32 %v4371_v38, %v2239_v5 }
 0xc65   : > { %v2200_v60 = vpop.f32.mrb[46].mxu0  ;;  %v2242_v8 = vpop.f32.mrb[46].mxu1  ;;  %v2260_v13 = vadd.f32 %v2198_v24, %v2156_v0 }
 0xc66   : > { %v2514_v20 = vmul.f32 -1.442695, %v2246_v56  ;;  %v2247_v10 = vadd.f32 %v2200_v60, %v2158_v4  ;;  %v2202_v11 = vpop.f32.mrb[47].mxu0  ;;  %v2869_v12 = vpop.f32.mrb[47].mxu1  ;;  %v2275_v31 = vadd.f32 %v4371_v38, %v2242_v8 }
 0xc67   : > { %v2261_v15 = vadd.f32 %v2202_v11, %v2159_v9  ;;  %v2516_v3 = vmul.f32 -1.442695, %v2260_v13 }
 0xc68   : > { %3153 = vpow2.f32 %v2514_v20  ;;  %v2515_v14 = vmul.f32 -1.442695, %v2247_v10 }
 0xc69   : > { %v2517_v16 = vmul.f32 -1.442695, %v2261_v15 }
 0xc6a   : > { %3155 = vpow2.f32 %v2515_v14 }
 0xc6b   : > { %3157 = vpow2.f32 %v2516_v3 }
 0xc6c   : > { %3159 = vpow2.f32 %v2517_v16 }
 0xc72   : > { %v3154_v18 = vpop.eup %3153 }
 0xc73   : > { %v2254_v19 = vadd.f32 1.0, %v3154_v18 }
 0xc74   : > { %v3156_v22 = vpop.eup %3155 }
 0xc75   : > { %3161 = vrcp.f32 %v2254_v19  ;;  %v2255_v25 = vadd.f32 1.0, %v3156_v22  ;;  %v3158_v26 = vpop.eup %3157 }
 0xc76   : > { %v3160_v28 = vpop.eup %3159  ;;  %v2268_v33 = vadd.f32 1.0, %v3158_v26 }
 0xc77   : > { %3163 = vrcp.f32 %v2255_v25  ;;  %v2269_v54 = vadd.f32 1.0, %v3160_v28 }
 0xc78   : > { %3165 = vrcp.f32 %v2268_v33 }
 0xc79   : > { %3167 = vrcp.f32 %v2269_v54 }
 0xc7f   : > { %v3162_v44 = vpop.eup %3161 }
 0xc80   : > { %v2276_v32 = vmul.f32 %v3162_v44, %v2274_v40 }
 0xc81   : > { %v3164_v39 = vpop.eup %3163 }
 0xc82   : > { %v2278_v49 = vadd.f32 %v2276_v32, %v2157_v37  ;;  %v2277_v62 = vmul.f32 %v3164_v39, %v2275_v31  ;;  %v3166_v23 = vpop.eup %3165 }
 0xc83   : > { %v3168_v61 = vpop.eup %3167  ;;  %v2282_v53 = vsub.f32 1.0, %v3166_v23  ;;  %v2286_v50 = vmul.f32 %v3166_v23, %v4378_v47 }
 0xc84   : > { %3169 = vtanh.f32 %v2278_v49  ;;  %v2279_v63 = vadd.f32 %v2277_v62, %v2160_v6  ;;  %v2283_v35 = vsub.f32 1.0, %v3168_v61  ;;  %v2287_v52 = vmul.f32 %v3168_v61, %v4381_v59 }
 0xc86   : > { %3171 = vtanh.f32 %v2279_v63 }
 0xc8e   : > { %v3170_v42 = vpop.eup %3169 }
 0xc8f   : > { %v2284_v48 = vmul.f32 %v3170_v42, %v2282_v53 }
 0xc90   : > { %v3172_v36 = vpop.eup %3171 }
 0xc91   : > { %v2288_v17 = vadd.f32 %v2286_v50, %v2284_v48  ;;  %v2285_v38 = vmul.f32 %v3172_v36, %v2283_v35 }
 0xc93   : > { %v2304_v43 = vsel %vm2302_vm1, %v2288_v17, %v4378_v47  ;;  %v2289_v1 = vadd.f32 %v2287_v52, %v2285_v38 }
 0xc94   : > { %2306 = vst [vmem:[%s4413_s4] sm:$0xff] %v2304_v43 }
 0xc95   : > { %v2305_v29 = vsel %vm2303_vm2, %v2289_v1, %v4381_v59 }
 0xc96   : > { %2307 = vst [vmem:[%s4413_s4 + $0x8] sm:$0xff] %v2305_v29 }
 0xc97 PF: > { %s14_s17 = sadd.s32 1, %s3245_s17   ;;  %s4414_s15 = smov %s3241_s16 }
 0xc98   : > { %p11_p6 = scmp.ge.s32.totalorder %s14_s17, 4   ;;  %s4415_s16 = smov %s4417_s18 }
 0xc9a   :  { %13 = sbr.rel (!%p11_p6) target bundleno = 2 (0x2), region = 84 }

</bundles_post_ra>
